<compile_context>
chip_gen: v5e
topology: v5e:2x2
jax: 0.10.0
libtpu: 0.0.40
codegen_flags: <defaults>
</compile_context>

<pallas_src>
import jax
import jax.numpy as jnp
from jax.experimental import pallas as pl
from jax.experimental.pallas import tpu as pltpu  # noqa: F401  (TPU backend / future tuning knobs)


def lstm_encoder_kernel(x0_ref, lat_ref, eps_ref, h0_ref, c0_ref,
                        w_all_ref, b_ref, wf_ref, bf_ref,
                        mu_ref, lv_ref, path_ref):
    B, S = lat_ref.shape
    H = h0_ref.shape[1]

    # Load weights / constants once (whole arrays are VMEM-resident).
    w_all = w_all_ref[...]            # (H+2, 4H)
    bias = b_ref[...]                 # (1, 4H)
    wf = wf_ref[...]                  # (H, 2)
    bf = bf_ref[...]                  # (1, 2)

    # Lane mask selecting the cellgate block [2H, 3H) — hoisted out of the loop
    # (JAX does not CSE broadcast_in_dim across unrolled iterations).
    lane = jax.lax.broadcasted_iota(jnp.int32, (B, 4 * H), 1)
    is_cellgate = (lane >= 2 * H) & (lane < 3 * H)

    # Recurrent carries live in vregs.
    h = h0_ref[...]                   # (B, H)
    c = c0_ref[...]                   # (B, H)
    x_cell = x0_ref[...]              # (B, 1)

    # Statically unrolled recurrence (S is small and static).
    for i in range(S):
        lat_i = lat_ref[:, i:i + 1]                               # (B, 1)

        # Single fused MXU contraction: [x, lat, h] @ [w_ih^T ; w_hh^T] + bias
        cat = jnp.concatenate([x_cell, lat_i, h], axis=1)         # (B, H+2)
        gates = jnp.dot(cat, w_all,
                        preferred_element_type=jnp.float32) + bias  # (B, 4H)

        # Full-lane-width activations: one sigmoid + one tanh over the whole
        # (B, 4H) vreg, then a single select (cellgate lanes take tanh).
        act = jnp.where(is_cellgate, jnp.tanh(gates), jax.nn.sigmoid(gates))

        ingate = act[:, 0:H]
        forgetgate = act[:, H:2 * H]
        cellgate = act[:, 2 * H:3 * H]
        outgate = act[:, 3 * H:4 * H]

        c = forgetgate * c + ingate * cellgate
        h = outgate * jnp.tanh(c)

        # final_layer: Linear(H, 2)
        out = jnp.dot(h, wf, preferred_element_type=jnp.float32) + bf   # (B, 2)
        mean = out[:, 0:1]
        logvar = out[:, 1:2]
        sampled = mean + eps_ref[:, i:i + 1] * jnp.exp(0.5 * logvar)

        # VMEM column writes (static lane slice); HBM writeback happens once,
        # densely, when the kernel finishes.
        mu_ref[:, i:i + 1] = mean
        lv_ref[:, i:i + 1] = logvar
        path_ref[:, i:i + 1] = sampled

        x_cell = sampled              # feed the sample back as next step's input


def lstm_encoder_forward(x0, latent, eps, h0, c0,
                         w_ih_t, w_hh_t, bias, w_fin_t, b_fin):
    B, H = h0.shape
    S = latent.shape[1]
    f32 = jnp.float32

    # Fuse input and hidden weight matrices: (2, 4H) + (H, 4H) -> (H+2, 4H).
    w_all = jnp.concatenate([w_ih_t, w_hh_t], axis=0).astype(f32)

    out_shape = (jax.ShapeDtypeStruct((B, S), f32),    # mu
                 jax.ShapeDtypeStruct((B, S), f32),    # logvar
                 jax.ShapeDtypeStruct((B, S), f32))    # paths

    # Advisory cost hint so XLA schedules surrounding ops around this tiny call.
    flops = S * (2 * B * (H + 2) * 4 * H + 2 * B * H * 2 + 12 * B * H)
    transcendentals = S * B * (2 * 4 * H + H + 1)      # sigmoid+tanh full vreg, tanh(c), exp
    bytes_accessed = 4 * (B * 1 + 2 * B * S + 2 * B * H
                          + (H + 2) * 4 * H + 4 * H + H * 2 + 2
                          + 3 * B * S)
    cost = pl.CostEstimate(flops=flops,
                           transcendentals=transcendentals,
                           bytes_accessed=bytes_accessed)

    # No grid, no BlockSpecs: every operand is a whole-array VMEM-resident block.
    mu, lv, paths = pl.pallas_call(
        lstm_encoder_kernel,
        out_shape=out_shape,
        cost_estimate=cost,
    )(x0.astype(f32), latent.astype(f32), eps.astype(f32),
      h0.astype(f32), c0.astype(f32),
      w_all, bias.astype(f32), w_fin_t.astype(f32), b_fin.astype(f32))

    return (mu, lv), paths


def reference_forward(x0, latent, eps, h0, c0,
                      w_ih_t, w_hh_t, bias, w_fin_t, b_fin):
    """Pure-JAX replica of the PyTorch forward (same precomputed eps)."""
    B = x0.shape[0]
    S = latent.shape[1]
    h, c = h0, c0
    x_cell = x0
    mus, lvs, paths = [], [], []
    for i in range(S):
        concat = jnp.concatenate([x_cell, latent[:, i:i + 1]], axis=1)   # (B, 2)
        gates = concat @ w_ih_t + h @ w_hh_t + bias                      # (B, 4H)
        H = h.shape[1]
        ig = jax.nn.sigmoid(gates[:, 0:H])
        fg = jax.nn.sigmoid(gates[:, H:2 * H])
        cg = jnp.tanh(gates[:, 2 * H:3 * H])
        og = jax.nn.sigmoid(gates[:, 3 * H:4 * H])
        c = fg * c + ig * cg
        h = og * jnp.tanh(c)
        x = h @ w_fin_t + b_fin
        mean, logvar = x[:, 0], x[:, 1]
        sampled = mean + eps[:, i] * jnp.exp(0.5 * logvar)
        mus.append(mean); lvs.append(logvar); paths.append(sampled)
        x_cell = sampled.reshape(B, 1)
    return (jnp.stack(mus, 1), jnp.stack(lvs, 1)), jnp.stack(paths, 1)


if __name__ == "__main__":
    B, INPUT_SIZE, H, S = 2, 1, 32, 8   # input_size=1 (the module feeds back a scalar path)

    key = jax.random.PRNGKey(0)
    ks = jax.random.split(key, 12)

    # Deterministic synthetic parameters (module __init__ shapes).
    w_ih = jax.random.normal(ks[0], (4 * H, INPUT_SIZE + 1), jnp.float32)    # (4H, 2)
    w_hh = jax.random.normal(ks[1], (4 * H, H), jnp.float32)                 # (4H, H)
    b_ih = jax.random.normal(ks[2], (4 * H,), jnp.float32)
    b_hh = jax.random.normal(ks[3], (4 * H,), jnp.float32)
    w_fin = 0.1 * jax.random.normal(ks[4], (2, H), jnp.float32)              # Linear(H, 2)
    b_fin = 0.1 * jax.random.normal(ks[5], (2,), jnp.float32)
    # scale_param = ones((S, 2)) is unused in forward.  # TODO(synk): unused in forward pass.

    w_ih_t = w_ih.T                        # (2, 4H)
    w_hh_t = w_hh.T                        # (H, 4H)
    bias = (b_ih + b_hh).reshape(1, 4 * H)
    w_fin_t = w_fin.T                      # (H, 2)
    b_fin2 = b_fin.reshape(1, 2)

    # Inputs.
    x0 = jax.random.normal(ks[6], (B, INPUT_SIZE), jnp.float32)
    latent = jax.random.normal(ks[7], (B, S), jnp.float32)
    h0 = jax.random.normal(ks[8], (B, H), jnp.float32)
    c0 = jax.random.normal(ks[9], (B, H), jnp.float32)
    # torch.randn_like noise, drawn once up front for determinism.
    eps = jax.random.normal(ks[10], (B, S), jnp.float32)

    (mu, logvar), paths = lstm_encoder_forward(
        x0, latent, eps, h0, c0, w_ih_t, w_hh_t, bias, w_fin_t, b_fin2)
    jax.block_until_ready((mu, logvar, paths))

    (mu_r, lv_r), paths_r = reference_forward(
        x0, latent, eps, h0, c0, w_ih_t, w_hh_t, bias, w_fin_t, b_fin2)

    assert mu.shape == (B, S) and logvar.shape == (B, S) and paths.shape == (B, S)
    assert jnp.allclose(mu, mu_r, rtol=1e-4, atol=1e-4)
    assert jnp.allclose(logvar, lv_r, rtol=1e-4, atol=1e-4)
    assert jnp.allclose(paths, paths_r, rtol=1e-4, atol=1e-4)

    print("KERNEL_OK")
</pallas_src>

<mosaic_0001>
module attributes {stable_mosaic.version = 11 : i64} {
  func.func @lstm_encoder_kernel(%arg0: memref<2x1xf32, #tpu.memory_space<vmem>>, %arg1: memref<2x8xf32, #tpu.memory_space<vmem>>, %arg2: memref<2x8xf32, #tpu.memory_space<vmem>>, %arg3: memref<2x32xf32, #tpu.memory_space<vmem>>, %arg4: memref<2x32xf32, #tpu.memory_space<vmem>>, %arg5: memref<34x128xf32, #tpu.memory_space<vmem>>, %arg6: memref<1x128xf32, #tpu.memory_space<vmem>>, %arg7: memref<32x2xf32, #tpu.memory_space<vmem>>, %arg8: memref<1x2xf32, #tpu.memory_space<vmem>>, %arg9: memref<2x8xf32, #tpu.memory_space<vmem>>, %arg10: memref<2x8xf32, #tpu.memory_space<vmem>>, %arg11: memref<2x8xf32, #tpu.memory_space<vmem>>) attributes {dimension_semantics = [], scalar_prefetch = 0 : i64, scratch_operands = 0 : i64, tpu.core_type = #tpu.core_type<tc>} {
    %c0 = arith.constant 0 : index
    %c0_0 = arith.constant 0 : index
    %0 = vector.load %arg5[%c0, %c0_0] : memref<34x128xf32, #tpu.memory_space<vmem>>, vector<34x128xf32>
    %c0_1 = arith.constant 0 : index
    %c0_2 = arith.constant 0 : index
    %1 = vector.load %arg6[%c0_1, %c0_2] : memref<1x128xf32, #tpu.memory_space<vmem>>, vector<1x128xf32>
    %c0_3 = arith.constant 0 : index
    %c0_4 = arith.constant 0 : index
    %2 = vector.load %arg7[%c0_3, %c0_4] : memref<32x2xf32, #tpu.memory_space<vmem>>, vector<32x2xf32>
    %c0_5 = arith.constant 0 : index
    %c0_6 = arith.constant 0 : index
    %3 = vector.load %arg8[%c0_5, %c0_6] : memref<1x2xf32, #tpu.memory_space<vmem>>, vector<1x2xf32>
    %4 = tpu.iota {dimensions = array<i32: 1>} : vector<2x128xi32>
    %c64_i32 = arith.constant 64 : i32
    %5 = vector.broadcast %c64_i32 : i32 to vector<2x128xi32>
    %6 = arith.cmpi sge, %4, %5 : vector<2x128xi32>
    %c96_i32 = arith.constant 96 : i32
    %7 = vector.broadcast %c96_i32 : i32 to vector<2x128xi32>
    %8 = arith.cmpi slt, %4, %7 : vector<2x128xi32>
    %9 = arith.andi %6, %8 : vector<2x128xi1>
    %c0_7 = arith.constant 0 : index
    %c0_8 = arith.constant 0 : index
    %10 = vector.load %arg3[%c0_7, %c0_8] : memref<2x32xf32, #tpu.memory_space<vmem>>, vector<2x32xf32>
    %c0_9 = arith.constant 0 : index
    %c0_10 = arith.constant 0 : index
    %11 = vector.load %arg4[%c0_9, %c0_10] : memref<2x32xf32, #tpu.memory_space<vmem>>, vector<2x32xf32>
    %c0_11 = arith.constant 0 : index
    %c0_12 = arith.constant 0 : index
    %12 = vector.load %arg0[%c0_11, %c0_12] : memref<2x1xf32, #tpu.memory_space<vmem>>, vector<2x1xf32>
    %c0_13 = arith.constant 0 : index
    %c0_14 = arith.constant 0 : index
    %13 = vector.load %arg1[%c0_13, %c0_14] : memref<2x8xf32, #tpu.memory_space<vmem>>, vector<2x1xf32>
    %14 = tpu.concatenate %12, %13, %10 in 1 : vector<2x1xf32>, vector<2x1xf32>, vector<2x32xf32> -> vector<2x34xf32>
    %cst = arith.constant dense<0.000000e+00> : vector<2x128xf32>
    %15 = tpu.matmul %14, %0, %cst {dimension_numbers = #tpu.dot_dimension_numbers<[1], [0], [0], [1], [0, 0, 1, 1], [], []>} : vector<2x34xf32>, vector<34x128xf32>, vector<2x128xf32> -> vector<2x128xf32>
    %16 = vector.broadcast %1 : vector<1x128xf32> to vector<2x128xf32>
    %17 = arith.addf %15, %16 : vector<2x128xf32>
    %18 = math.tanh %17 : vector<2x128xf32>
    %19 = arith.negf %17 : vector<2x128xf32>
    %20 = math.exp %19 : vector<2x128xf32>
    %cst_15 = arith.constant 1.000000e+00 : f32
    %21 = vector.broadcast %cst_15 : f32 to vector<2x128xf32>
    %22 = arith.addf %21, %20 : vector<2x128xf32>
    %23 = arith.divf %21, %22 : vector<2x128xf32>
    %24 = arith.select %9, %18, %23 : vector<2x128xi1>, vector<2x128xf32>
    %25 = vector.extract_strided_slice %24 {offsets = [0, 0], sizes = [2, 32], strides = [1, 1]} : vector<2x128xf32> to vector<2x32xf32>
    %26 = vector.extract_strided_slice %24 {offsets = [0, 32], sizes = [2, 32], strides = [1, 1]} : vector<2x128xf32> to vector<2x32xf32>
    %27 = vector.extract_strided_slice %24 {offsets = [0, 64], sizes = [2, 32], strides = [1, 1]} : vector<2x128xf32> to vector<2x32xf32>
    %28 = vector.extract_strided_slice %24 {offsets = [0, 96], sizes = [2, 32], strides = [1, 1]} : vector<2x128xf32> to vector<2x32xf32>
    %29 = arith.mulf %26, %11 : vector<2x32xf32>
    %30 = arith.mulf %25, %27 : vector<2x32xf32>
    %31 = arith.addf %29, %30 : vector<2x32xf32>
    %32 = math.tanh %31 : vector<2x32xf32>
    %33 = arith.mulf %28, %32 : vector<2x32xf32>
    %cst_16 = arith.constant dense<0.000000e+00> : vector<2x2xf32>
    %34 = tpu.matmul %33, %2, %cst_16 {dimension_numbers = #tpu.dot_dimension_numbers<[1], [0], [0], [1], [0, 0, 1, 1], [], []>} : vector<2x32xf32>, vector<32x2xf32>, vector<2x2xf32> -> vector<2x2xf32>
    %35 = vector.broadcast %3 : vector<1x2xf32> to vector<2x2xf32>
    %36 = arith.addf %34, %35 : vector<2x2xf32>
    %37 = vector.extract_strided_slice %36 {offsets = [0, 0], sizes = [2, 1], strides = [1, 1]} : vector<2x2xf32> to vector<2x1xf32>
    %38 = vector.extract_strided_slice %36 {offsets = [0, 1], sizes = [2, 1], strides = [1, 1]} : vector<2x2xf32> to vector<2x1xf32>
    %c0_17 = arith.constant 0 : index
    %c0_18 = arith.constant 0 : index
    %39 = vector.load %arg2[%c0_17, %c0_18] : memref<2x8xf32, #tpu.memory_space<vmem>>, vector<2x1xf32>
    %cst_19 = arith.constant 5.000000e-01 : f32
    %40 = vector.broadcast %cst_19 : f32 to vector<2x1xf32>
    %41 = arith.mulf %40, %38 : vector<2x1xf32>
    %42 = math.exp %41 : vector<2x1xf32>
    %43 = arith.mulf %39, %42 : vector<2x1xf32>
    %44 = arith.addf %37, %43 : vector<2x1xf32>
    %c0_20 = arith.constant 0 : index
    %c0_21 = arith.constant 0 : index
    %45 = vector.load %arg9[%c0_20, %c0_21] : memref<2x8xf32, #tpu.memory_space<vmem>>, vector<2x1xf32>
    tpu.vector_store %arg9[%c0_20, %c0_21], %37 {strides = array<i32>} : memref<2x8xf32, #tpu.memory_space<vmem>>, vector<2x1xf32>,
    %c0_22 = arith.constant 0 : index
    %c0_23 = arith.constant 0 : index
    %46 = vector.load %arg10[%c0_22, %c0_23] : memref<2x8xf32, #tpu.memory_space<vmem>>, vector<2x1xf32>
    tpu.vector_store %arg10[%c0_22, %c0_23], %38 {strides = array<i32>} : memref<2x8xf32, #tpu.memory_space<vmem>>, vector<2x1xf32>,
    %c0_24 = arith.constant 0 : index
    %c0_25 = arith.constant 0 : index
    %47 = vector.load %arg11[%c0_24, %c0_25] : memref<2x8xf32, #tpu.memory_space<vmem>>, vector<2x1xf32>
    tpu.vector_store %arg11[%c0_24, %c0_25], %44 {strides = array<i32>} : memref<2x8xf32, #tpu.memory_space<vmem>>, vector<2x1xf32>,
    %c0_26 = arith.constant 0 : index
    %c1 = arith.constant 1 : index
    %48 = vector.load %arg1[%c0_26, %c1] : memref<2x8xf32, #tpu.memory_space<vmem>>, vector<2x1xf32>
    %49 = tpu.concatenate %44, %48, %33 in 1 : vector<2x1xf32>, vector<2x1xf32>, vector<2x32xf32> -> vector<2x34xf32>
    %cst_27 = arith.constant dense<0.000000e+00> : vector<2x128xf32>
    %50 = tpu.matmul %49, %0, %cst_27 {dimension_numbers = #tpu.dot_dimension_numbers<[1], [0], [0], [1], [0, 0, 1, 1], [], []>} : vector<2x34xf32>, vector<34x128xf32>, vector<2x128xf32> -> vector<2x128xf32>
    %51 = vector.broadcast %1 : vector<1x128xf32> to vector<2x128xf32>
    %52 = arith.addf %50, %51 : vector<2x128xf32>
    %53 = math.tanh %52 : vector<2x128xf32>
    %54 = arith.negf %52 : vector<2x128xf32>
    %55 = math.exp %54 : vector<2x128xf32>
    %cst_28 = arith.constant 1.000000e+00 : f32
    %56 = vector.broadcast %cst_28 : f32 to vector<2x128xf32>
    %57 = arith.addf %56, %55 : vector<2x128xf32>
    %58 = arith.divf %56, %57 : vector<2x128xf32>
    %59 = arith.select %9, %53, %58 : vector<2x128xi1>, vector<2x128xf32>
    %60 = vector.extract_strided_slice %59 {offsets = [0, 0], sizes = [2, 32], strides = [1, 1]} : vector<2x128xf32> to vector<2x32xf32>
    %61 = vector.extract_strided_slice %59 {offsets = [0, 32], sizes = [2, 32], strides = [1, 1]} : vector<2x128xf32> to vector<2x32xf32>
    %62 = vector.extract_strided_slice %59 {offsets = [0, 64], sizes = [2, 32], strides = [1, 1]} : vector<2x128xf32> to vector<2x32xf32>
    %63 = vector.extract_strided_slice %59 {offsets = [0, 96], sizes = [2, 32], strides = [1, 1]} : vector<2x128xf32> to vector<2x32xf32>
    %64 = arith.mulf %61, %31 : vector<2x32xf32>
    %65 = arith.mulf %60, %62 : vector<2x32xf32>
    %66 = arith.addf %64, %65 : vector<2x32xf32>
    %67 = math.tanh %66 : vector<2x32xf32>
    %68 = arith.mulf %63, %67 : vector<2x32xf32>
    %cst_29 = arith.constant dense<0.000000e+00> : vector<2x2xf32>
    %69 = tpu.matmul %68, %2, %cst_29 {dimension_numbers = #tpu.dot_dimension_numbers<[1], [0], [0], [1], [0, 0, 1, 1], [], []>} : vector<2x32xf32>, vector<32x2xf32>, vector<2x2xf32> -> vector<2x2xf32>
    %70 = vector.broadcast %3 : vector<1x2xf32> to vector<2x2xf32>
    %71 = arith.addf %69, %70 : vector<2x2xf32>
    %72 = vector.extract_strided_slice %71 {offsets = [0, 0], sizes = [2, 1], strides = [1, 1]} : vector<2x2xf32> to vector<2x1xf32>
    %73 = vector.extract_strided_slice %71 {offsets = [0, 1], sizes = [2, 1], strides = [1, 1]} : vector<2x2xf32> to vector<2x1xf32>
    %c0_30 = arith.constant 0 : index
    %c1_31 = arith.constant 1 : index
    %74 = vector.load %arg2[%c0_30, %c1_31] : memref<2x8xf32, #tpu.memory_space<vmem>>, vector<2x1xf32>
    %cst_32 = arith.constant 5.000000e-01 : f32
    %75 = vector.broadcast %cst_32 : f32 to vector<2x1xf32>
    %76 = arith.mulf %75, %73 : vector<2x1xf32>
    %77 = math.exp %76 : vector<2x1xf32>
    %78 = arith.mulf %74, %77 : vector<2x1xf32>
    %79 = arith.addf %72, %78 : vector<2x1xf32>
    %c0_33 = arith.constant 0 : index
    %c1_34 = arith.constant 1 : index
    %80 = vector.load %arg9[%c0_33, %c1_34] : memref<2x8xf32, #tpu.memory_space<vmem>>, vector<2x1xf32>
    tpu.vector_store %arg9[%c0_33, %c1_34], %72 {strides = array<i32>} : memref<2x8xf32, #tpu.memory_space<vmem>>, vector<2x1xf32>,
    %c0_35 = arith.constant 0 : index
    %c1_36 = arith.constant 1 : index
    %81 = vector.load %arg10[%c0_35, %c1_36] : memref<2x8xf32, #tpu.memory_space<vmem>>, vector<2x1xf32>
    tpu.vector_store %arg10[%c0_35, %c1_36], %73 {strides = array<i32>} : memref<2x8xf32, #tpu.memory_space<vmem>>, vector<2x1xf32>,
    %c0_37 = arith.constant 0 : index
    %c1_38 = arith.constant 1 : index
    %82 = vector.load %arg11[%c0_37, %c1_38] : memref<2x8xf32, #tpu.memory_space<vmem>>, vector<2x1xf32>
    tpu.vector_store %arg11[%c0_37, %c1_38], %79 {strides = array<i32>} : memref<2x8xf32, #tpu.memory_space<vmem>>, vector<2x1xf32>,
    %c0_39 = arith.constant 0 : index
    %c2 = arith.constant 2 : index
    %83 = vector.load %arg1[%c0_39, %c2] : memref<2x8xf32, #tpu.memory_space<vmem>>, vector<2x1xf32>
    %84 = tpu.concatenate %79, %83, %68 in 1 : vector<2x1xf32>, vector<2x1xf32>, vector<2x32xf32> -> vector<2x34xf32>
    %cst_40 = arith.constant dense<0.000000e+00> : vector<2x128xf32>
    %85 = tpu.matmul %84, %0, %cst_40 {dimension_numbers = #tpu.dot_dimension_numbers<[1], [0], [0], [1], [0, 0, 1, 1], [], []>} : vector<2x34xf32>, vector<34x128xf32>, vector<2x128xf32> -> vector<2x128xf32>
    %86 = vector.broadcast %1 : vector<1x128xf32> to vector<2x128xf32>
    %87 = arith.addf %85, %86 : vector<2x128xf32>
    %88 = math.tanh %87 : vector<2x128xf32>
    %89 = arith.negf %87 : vector<2x128xf32>
    %90 = math.exp %89 : vector<2x128xf32>
    %cst_41 = arith.constant 1.000000e+00 : f32
    %91 = vector.broadcast %cst_41 : f32 to vector<2x128xf32>
    %92 = arith.addf %91, %90 : vector<2x128xf32>
    %93 = arith.divf %91, %92 : vector<2x128xf32>
    %94 = arith.select %9, %88, %93 : vector<2x128xi1>, vector<2x128xf32>
    %95 = vector.extract_strided_slice %94 {offsets = [0, 0], sizes = [2, 32], strides = [1, 1]} : vector<2x128xf32> to vector<2x32xf32>
    %96 = vector.extract_strided_slice %94 {offsets = [0, 32], sizes = [2, 32], strides = [1, 1]} : vector<2x128xf32> to vector<2x32xf32>
    %97 = vector.extract_strided_slice %94 {offsets = [0, 64], sizes = [2, 32], strides = [1, 1]} : vector<2x128xf32> to vector<2x32xf32>
    %98 = vector.extract_strided_slice %94 {offsets = [0, 96], sizes = [2, 32], strides = [1, 1]} : vector<2x128xf32> to vector<2x32xf32>
    %99 = arith.mulf %96, %66 : vector<2x32xf32>
    %100 = arith.mulf %95, %97 : vector<2x32xf32>
    %101 = arith.addf %99, %100 : vector<2x32xf32>
    %102 = math.tanh %101 : vector<2x32xf32>
    %103 = arith.mulf %98, %102 : vector<2x32xf32>
    %cst_42 = arith.constant dense<0.000000e+00> : vector<2x2xf32>
    %104 = tpu.matmul %103, %2, %cst_42 {dimension_numbers = #tpu.dot_dimension_numbers<[1], [0], [0], [1], [0, 0, 1, 1], [], []>} : vector<2x32xf32>, vector<32x2xf32>, vector<2x2xf32> -> vector<2x2xf32>
    %105 = vector.broadcast %3 : vector<1x2xf32> to vector<2x2xf32>
    %106 = arith.addf %104, %105 : vector<2x2xf32>
    %107 = vector.extract_strided_slice %106 {offsets = [0, 0], sizes = [2, 1], strides = [1, 1]} : vector<2x2xf32> to vector<2x1xf32>
    %108 = vector.extract_strided_slice %106 {offsets = [0, 1], sizes = [2, 1], strides = [1, 1]} : vector<2x2xf32> to vector<2x1xf32>
    %c0_43 = arith.constant 0 : index
    %c2_44 = arith.constant 2 : index
    %109 = vector.load %arg2[%c0_43, %c2_44] : memref<2x8xf32, #tpu.memory_space<vmem>>, vector<2x1xf32>
    %cst_45 = arith.constant 5.000000e-01 : f32
    %110 = vector.broadcast %cst_45 : f32 to vector<2x1xf32>
    %111 = arith.mulf %110, %108 : vector<2x1xf32>
    %112 = math.exp %111 : vector<2x1xf32>
    %113 = arith.mulf %109, %112 : vector<2x1xf32>
    %114 = arith.addf %107, %113 : vector<2x1xf32>
    %c0_46 = arith.constant 0 : index
    %c2_47 = arith.constant 2 : index
    %115 = vector.load %arg9[%c0_46, %c2_47] : memref<2x8xf32, #tpu.memory_space<vmem>>, vector<2x1xf32>
    tpu.vector_store %arg9[%c0_46, %c2_47], %107 {strides = array<i32>} : memref<2x8xf32, #tpu.memory_space<vmem>>, vector<2x1xf32>,
    %c0_48 = arith.constant 0 : index
    %c2_49 = arith.constant 2 : index
    %116 = vector.load %arg10[%c0_48, %c2_49] : memref<2x8xf32, #tpu.memory_space<vmem>>, vector<2x1xf32>
    tpu.vector_store %arg10[%c0_48, %c2_49], %108 {strides = array<i32>} : memref<2x8xf32, #tpu.memory_space<vmem>>, vector<2x1xf32>,
    %c0_50 = arith.constant 0 : index
    %c2_51 = arith.constant 2 : index
    %117 = vector.load %arg11[%c0_50, %c2_51] : memref<2x8xf32, #tpu.memory_space<vmem>>, vector<2x1xf32>
    tpu.vector_store %arg11[%c0_50, %c2_51], %114 {strides = array<i32>} : memref<2x8xf32, #tpu.memory_space<vmem>>, vector<2x1xf32>,
    %c0_52 = arith.constant 0 : index
    %c3 = arith.constant 3 : index
    %118 = vector.load %arg1[%c0_52, %c3] : memref<2x8xf32, #tpu.memory_space<vmem>>, vector<2x1xf32>
    %119 = tpu.concatenate %114, %118, %103 in 1 : vector<2x1xf32>, vector<2x1xf32>, vector<2x32xf32> -> vector<2x34xf32>
    %cst_53 = arith.constant dense<0.000000e+00> : vector<2x128xf32>
    %120 = tpu.matmul %119, %0, %cst_53 {dimension_numbers = #tpu.dot_dimension_numbers<[1], [0], [0], [1], [0, 0, 1, 1], [], []>} : vector<2x34xf32>, vector<34x128xf32>, vector<2x128xf32> -> vector<2x128xf32>
    %121 = vector.broadcast %1 : vector<1x128xf32> to vector<2x128xf32>
    %122 = arith.addf %120, %121 : vector<2x128xf32>
    %123 = math.tanh %122 : vector<2x128xf32>
    %124 = arith.negf %122 : vector<2x128xf32>
    %125 = math.exp %124 : vector<2x128xf32>
    %cst_54 = arith.constant 1.000000e+00 : f32
    %126 = vector.broadcast %cst_54 : f32 to vector<2x128xf32>
    %127 = arith.addf %126, %125 : vector<2x128xf32>
    %128 = arith.divf %126, %127 : vector<2x128xf32>
    %129 = arith.select %9, %123, %128 : vector<2x128xi1>, vector<2x128xf32>
    %130 = vector.extract_strided_slice %129 {offsets = [0, 0], sizes = [2, 32], strides = [1, 1]} : vector<2x128xf32> to vector<2x32xf32>
    %131 = vector.extract_strided_slice %129 {offsets = [0, 32], sizes = [2, 32], strides = [1, 1]} : vector<2x128xf32> to vector<2x32xf32>
    %132 = vector.extract_strided_slice %129 {offsets = [0, 64], sizes = [2, 32], strides = [1, 1]} : vector<2x128xf32> to vector<2x32xf32>
    %133 = vector.extract_strided_slice %129 {offsets = [0, 96], sizes = [2, 32], strides = [1, 1]} : vector<2x128xf32> to vector<2x32xf32>
    %134 = arith.mulf %131, %101 : vector<2x32xf32>
    %135 = arith.mulf %130, %132 : vector<2x32xf32>
    %136 = arith.addf %134, %135 : vector<2x32xf32>
    %137 = math.tanh %136 : vector<2x32xf32>
    %138 = arith.mulf %133, %137 : vector<2x32xf32>
    %cst_55 = arith.constant dense<0.000000e+00> : vector<2x2xf32>
    %139 = tpu.matmul %138, %2, %cst_55 {dimension_numbers = #tpu.dot_dimension_numbers<[1], [0], [0], [1], [0, 0, 1, 1], [], []>} : vector<2x32xf32>, vector<32x2xf32>, vector<2x2xf32> -> vector<2x2xf32>
    %140 = vector.broadcast %3 : vector<1x2xf32> to vector<2x2xf32>
    %141 = arith.addf %139, %140 : vector<2x2xf32>
    %142 = vector.extract_strided_slice %141 {offsets = [0, 0], sizes = [2, 1], strides = [1, 1]} : vector<2x2xf32> to vector<2x1xf32>
    %143 = vector.extract_strided_slice %141 {offsets = [0, 1], sizes = [2, 1], strides = [1, 1]} : vector<2x2xf32> to vector<2x1xf32>
    %c0_56 = arith.constant 0 : index
    %c3_57 = arith.constant 3 : index
    %144 = vector.load %arg2[%c0_56, %c3_57] : memref<2x8xf32, #tpu.memory_space<vmem>>, vector<2x1xf32>
    %cst_58 = arith.constant 5.000000e-01 : f32
    %145 = vector.broadcast %cst_58 : f32 to vector<2x1xf32>
    %146 = arith.mulf %145, %143 : vector<2x1xf32>
    %147 = math.exp %146 : vector<2x1xf32>
    %148 = arith.mulf %144, %147 : vector<2x1xf32>
    %149 = arith.addf %142, %148 : vector<2x1xf32>
    %c0_59 = arith.constant 0 : index
    %c3_60 = arith.constant 3 : index
    %150 = vector.load %arg9[%c0_59, %c3_60] : memref<2x8xf32, #tpu.memory_space<vmem>>, vector<2x1xf32>
    tpu.vector_store %arg9[%c0_59, %c3_60], %142 {strides = array<i32>} : memref<2x8xf32, #tpu.memory_space<vmem>>, vector<2x1xf32>,
    %c0_61 = arith.constant 0 : index
    %c3_62 = arith.constant 3 : index
    %151 = vector.load %arg10[%c0_61, %c3_62] : memref<2x8xf32, #tpu.memory_space<vmem>>, vector<2x1xf32>
    tpu.vector_store %arg10[%c0_61, %c3_62], %143 {strides = array<i32>} : memref<2x8xf32, #tpu.memory_space<vmem>>, vector<2x1xf32>,
    %c0_63 = arith.constant 0 : index
    %c3_64 = arith.constant 3 : index
    %152 = vector.load %arg11[%c0_63, %c3_64] : memref<2x8xf32, #tpu.memory_space<vmem>>, vector<2x1xf32>
    tpu.vector_store %arg11[%c0_63, %c3_64], %149 {strides = array<i32>} : memref<2x8xf32, #tpu.memory_space<vmem>>, vector<2x1xf32>,
    %c0_65 = arith.constant 0 : index
    %c4 = arith.constant 4 : index
    %153 = vector.load %arg1[%c0_65, %c4] : memref<2x8xf32, #tpu.memory_space<vmem>>, vector<2x1xf32>
    %154 = tpu.concatenate %149, %153, %138 in 1 : vector<2x1xf32>, vector<2x1xf32>, vector<2x32xf32> -> vector<2x34xf32>
    %cst_66 = arith.constant dense<0.000000e+00> : vector<2x128xf32>
    %155 = tpu.matmul %154, %0, %cst_66 {dimension_numbers = #tpu.dot_dimension_numbers<[1], [0], [0], [1], [0, 0, 1, 1], [], []>} : vector<2x34xf32>, vector<34x128xf32>, vector<2x128xf32> -> vector<2x128xf32>
    %156 = vector.broadcast %1 : vector<1x128xf32> to vector<2x128xf32>
    %157 = arith.addf %155, %156 : vector<2x128xf32>
    %158 = math.tanh %157 : vector<2x128xf32>
    %159 = arith.negf %157 : vector<2x128xf32>
    %160 = math.exp %159 : vector<2x128xf32>
    %cst_67 = arith.constant 1.000000e+00 : f32
    %161 = vector.broadcast %cst_67 : f32 to vector<2x128xf32>
    %162 = arith.addf %161, %160 : vector<2x128xf32>
    %163 = arith.divf %161, %162 : vector<2x128xf32>
    %164 = arith.select %9, %158, %163 : vector<2x128xi1>, vector<2x128xf32>
    %165 = vector.extract_strided_slice %164 {offsets = [0, 0], sizes = [2, 32], strides = [1, 1]} : vector<2x128xf32> to vector<2x32xf32>
    %166 = vector.extract_strided_slice %164 {offsets = [0, 32], sizes = [2, 32], strides = [1, 1]} : vector<2x128xf32> to vector<2x32xf32>
    %167 = vector.extract_strided_slice %164 {offsets = [0, 64], sizes = [2, 32], strides = [1, 1]} : vector<2x128xf32> to vector<2x32xf32>
    %168 = vector.extract_strided_slice %164 {offsets = [0, 96], sizes = [2, 32], strides = [1, 1]} : vector<2x128xf32> to vector<2x32xf32>
    %169 = arith.mulf %166, %136 : vector<2x32xf32>
    %170 = arith.mulf %165, %167 : vector<2x32xf32>
    %171 = arith.addf %169, %170 : vector<2x32xf32>
    %172 = math.tanh %171 : vector<2x32xf32>
    %173 = arith.mulf %168, %172 : vector<2x32xf32>
    %cst_68 = arith.constant dense<0.000000e+00> : vector<2x2xf32>
    %174 = tpu.matmul %173, %2, %cst_68 {dimension_numbers = #tpu.dot_dimension_numbers<[1], [0], [0], [1], [0, 0, 1, 1], [], []>} : vector<2x32xf32>, vector<32x2xf32>, vector<2x2xf32> -> vector<2x2xf32>
    %175 = vector.broadcast %3 : vector<1x2xf32> to vector<2x2xf32>
    %176 = arith.addf %174, %175 : vector<2x2xf32>
    %177 = vector.extract_strided_slice %176 {offsets = [0, 0], sizes = [2, 1], strides = [1, 1]} : vector<2x2xf32> to vector<2x1xf32>
    %178 = vector.extract_strided_slice %176 {offsets = [0, 1], sizes = [2, 1], strides = [1, 1]} : vector<2x2xf32> to vector<2x1xf32>
    %c0_69 = arith.constant 0 : index
    %c4_70 = arith.constant 4 : index
    %179 = vector.load %arg2[%c0_69, %c4_70] : memref<2x8xf32, #tpu.memory_space<vmem>>, vector<2x1xf32>
    %cst_71 = arith.constant 5.000000e-01 : f32
    %180 = vector.broadcast %cst_71 : f32 to vector<2x1xf32>
    %181 = arith.mulf %180, %178 : vector<2x1xf32>
    %182 = math.exp %181 : vector<2x1xf32>
    %183 = arith.mulf %179, %182 : vector<2x1xf32>
    %184 = arith.addf %177, %183 : vector<2x1xf32>
    %c0_72 = arith.constant 0 : index
    %c4_73 = arith.constant 4 : index
    %185 = vector.load %arg9[%c0_72, %c4_73] : memref<2x8xf32, #tpu.memory_space<vmem>>, vector<2x1xf32>
    tpu.vector_store %arg9[%c0_72, %c4_73], %177 {strides = array<i32>} : memref<2x8xf32, #tpu.memory_space<vmem>>, vector<2x1xf32>,
    %c0_74 = arith.constant 0 : index
    %c4_75 = arith.constant 4 : index
    %186 = vector.load %arg10[%c0_74, %c4_75] : memref<2x8xf32, #tpu.memory_space<vmem>>, vector<2x1xf32>
    tpu.vector_store %arg10[%c0_74, %c4_75], %178 {strides = array<i32>} : memref<2x8xf32, #tpu.memory_space<vmem>>, vector<2x1xf32>,
    %c0_76 = arith.constant 0 : index
    %c4_77 = arith.constant 4 : index
    %187 = vector.load %arg11[%c0_76, %c4_77] : memref<2x8xf32, #tpu.memory_space<vmem>>, vector<2x1xf32>
    tpu.vector_store %arg11[%c0_76, %c4_77], %184 {strides = array<i32>} : memref<2x8xf32, #tpu.memory_space<vmem>>, vector<2x1xf32>,
    %c0_78 = arith.constant 0 : index
    %c5 = arith.constant 5 : index
    %188 = vector.load %arg1[%c0_78, %c5] : memref<2x8xf32, #tpu.memory_space<vmem>>, vector<2x1xf32>
    %189 = tpu.concatenate %184, %188, %173 in 1 : vector<2x1xf32>, vector<2x1xf32>, vector<2x32xf32> -> vector<2x34xf32>
    %cst_79 = arith.constant dense<0.000000e+00> : vector<2x128xf32>
    %190 = tpu.matmul %189, %0, %cst_79 {dimension_numbers = #tpu.dot_dimension_numbers<[1], [0], [0], [1], [0, 0, 1, 1], [], []>} : vector<2x34xf32>, vector<34x128xf32>, vector<2x128xf32> -> vector<2x128xf32>
    %191 = vector.broadcast %1 : vector<1x128xf32> to vector<2x128xf32>
    %192 = arith.addf %190, %191 : vector<2x128xf32>
    %193 = math.tanh %192 : vector<2x128xf32>
    %194 = arith.negf %192 : vector<2x128xf32>
    %195 = math.exp %194 : vector<2x128xf32>
    %cst_80 = arith.constant 1.000000e+00 : f32
    %196 = vector.broadcast %cst_80 : f32 to vector<2x128xf32>
    %197 = arith.addf %196, %195 : vector<2x128xf32>
    %198 = arith.divf %196, %197 : vector<2x128xf32>
    %199 = arith.select %9, %193, %198 : vector<2x128xi1>, vector<2x128xf32>
    %200 = vector.extract_strided_slice %199 {offsets = [0, 0], sizes = [2, 32], strides = [1, 1]} : vector<2x128xf32> to vector<2x32xf32>
    %201 = vector.extract_strided_slice %199 {offsets = [0, 32], sizes = [2, 32], strides = [1, 1]} : vector<2x128xf32> to vector<2x32xf32>
    %202 = vector.extract_strided_slice %199 {offsets = [0, 64], sizes = [2, 32], strides = [1, 1]} : vector<2x128xf32> to vector<2x32xf32>
    %203 = vector.extract_strided_slice %199 {offsets = [0, 96], sizes = [2, 32], strides = [1, 1]} : vector<2x128xf32> to vector<2x32xf32>
    %204 = arith.mulf %201, %171 : vector<2x32xf32>
    %205 = arith.mulf %200, %202 : vector<2x32xf32>
    %206 = arith.addf %204, %205 : vector<2x32xf32>
    %207 = math.tanh %206 : vector<2x32xf32>
    %208 = arith.mulf %203, %207 : vector<2x32xf32>
    %cst_81 = arith.constant dense<0.000000e+00> : vector<2x2xf32>
    %209 = tpu.matmul %208, %2, %cst_81 {dimension_numbers = #tpu.dot_dimension_numbers<[1], [0], [0], [1], [0, 0, 1, 1], [], []>} : vector<2x32xf32>, vector<32x2xf32>, vector<2x2xf32> -> vector<2x2xf32>
    %210 = vector.broadcast %3 : vector<1x2xf32> to vector<2x2xf32>
    %211 = arith.addf %209, %210 : vector<2x2xf32>
    %212 = vector.extract_strided_slice %211 {offsets = [0, 0], sizes = [2, 1], strides = [1, 1]} : vector<2x2xf32> to vector<2x1xf32>
    %213 = vector.extract_strided_slice %211 {offsets = [0, 1], sizes = [2, 1], strides = [1, 1]} : vector<2x2xf32> to vector<2x1xf32>
    %c0_82 = arith.constant 0 : index
    %c5_83 = arith.constant 5 : index
    %214 = vector.load %arg2[%c0_82, %c5_83] : memref<2x8xf32, #tpu.memory_space<vmem>>, vector<2x1xf32>
    %cst_84 = arith.constant 5.000000e-01 : f32
    %215 = vector.broadcast %cst_84 : f32 to vector<2x1xf32>
    %216 = arith.mulf %215, %213 : vector<2x1xf32>
    %217 = math.exp %216 : vector<2x1xf32>
    %218 = arith.mulf %214, %217 : vector<2x1xf32>
    %219 = arith.addf %212, %218 : vector<2x1xf32>
    %c0_85 = arith.constant 0 : index
    %c5_86 = arith.constant 5 : index
    %220 = vector.load %arg9[%c0_85, %c5_86] : memref<2x8xf32, #tpu.memory_space<vmem>>, vector<2x1xf32>
    tpu.vector_store %arg9[%c0_85, %c5_86], %212 {strides = array<i32>} : memref<2x8xf32, #tpu.memory_space<vmem>>, vector<2x1xf32>,
    %c0_87 = arith.constant 0 : index
    %c5_88 = arith.constant 5 : index
    %221 = vector.load %arg10[%c0_87, %c5_88] : memref<2x8xf32, #tpu.memory_space<vmem>>, vector<2x1xf32>
    tpu.vector_store %arg10[%c0_87, %c5_88], %213 {strides = array<i32>} : memref<2x8xf32, #tpu.memory_space<vmem>>, vector<2x1xf32>,
    %c0_89 = arith.constant 0 : index
    %c5_90 = arith.constant 5 : index
    %222 = vector.load %arg11[%c0_89, %c5_90] : memref<2x8xf32, #tpu.memory_space<vmem>>, vector<2x1xf32>
    tpu.vector_store %arg11[%c0_89, %c5_90], %219 {strides = array<i32>} : memref<2x8xf32, #tpu.memory_space<vmem>>, vector<2x1xf32>,
    %c0_91 = arith.constant 0 : index
    %c6 = arith.constant 6 : index
    %223 = vector.load %arg1[%c0_91, %c6] : memref<2x8xf32, #tpu.memory_space<vmem>>, vector<2x1xf32>
    %224 = tpu.concatenate %219, %223, %208 in 1 : vector<2x1xf32>, vector<2x1xf32>, vector<2x32xf32> -> vector<2x34xf32>
    %cst_92 = arith.constant dense<0.000000e+00> : vector<2x128xf32>
    %225 = tpu.matmul %224, %0, %cst_92 {dimension_numbers = #tpu.dot_dimension_numbers<[1], [0], [0], [1], [0, 0, 1, 1], [], []>} : vector<2x34xf32>, vector<34x128xf32>, vector<2x128xf32> -> vector<2x128xf32>
    %226 = vector.broadcast %1 : vector<1x128xf32> to vector<2x128xf32>
    %227 = arith.addf %225, %226 : vector<2x128xf32>
    %228 = math.tanh %227 : vector<2x128xf32>
    %229 = arith.negf %227 : vector<2x128xf32>
    %230 = math.exp %229 : vector<2x128xf32>
    %cst_93 = arith.constant 1.000000e+00 : f32
    %231 = vector.broadcast %cst_93 : f32 to vector<2x128xf32>
    %232 = arith.addf %231, %230 : vector<2x128xf32>
    %233 = arith.divf %231, %232 : vector<2x128xf32>
    %234 = arith.select %9, %228, %233 : vector<2x128xi1>, vector<2x128xf32>
    %235 = vector.extract_strided_slice %234 {offsets = [0, 0], sizes = [2, 32], strides = [1, 1]} : vector<2x128xf32> to vector<2x32xf32>
    %236 = vector.extract_strided_slice %234 {offsets = [0, 32], sizes = [2, 32], strides = [1, 1]} : vector<2x128xf32> to vector<2x32xf32>
    %237 = vector.extract_strided_slice %234 {offsets = [0, 64], sizes = [2, 32], strides = [1, 1]} : vector<2x128xf32> to vector<2x32xf32>
    %238 = vector.extract_strided_slice %234 {offsets = [0, 96], sizes = [2, 32], strides = [1, 1]} : vector<2x128xf32> to vector<2x32xf32>
    %239 = arith.mulf %236, %206 : vector<2x32xf32>
    %240 = arith.mulf %235, %237 : vector<2x32xf32>
    %241 = arith.addf %239, %240 : vector<2x32xf32>
    %242 = math.tanh %241 : vector<2x32xf32>
    %243 = arith.mulf %238, %242 : vector<2x32xf32>
    %cst_94 = arith.constant dense<0.000000e+00> : vector<2x2xf32>
    %244 = tpu.matmul %243, %2, %cst_94 {dimension_numbers = #tpu.dot_dimension_numbers<[1], [0], [0], [1], [0, 0, 1, 1], [], []>} : vector<2x32xf32>, vector<32x2xf32>, vector<2x2xf32> -> vector<2x2xf32>
    %245 = vector.broadcast %3 : vector<1x2xf32> to vector<2x2xf32>
    %246 = arith.addf %244, %245 : vector<2x2xf32>
    %247 = vector.extract_strided_slice %246 {offsets = [0, 0], sizes = [2, 1], strides = [1, 1]} : vector<2x2xf32> to vector<2x1xf32>
    %248 = vector.extract_strided_slice %246 {offsets = [0, 1], sizes = [2, 1], strides = [1, 1]} : vector<2x2xf32> to vector<2x1xf32>
    %c0_95 = arith.constant 0 : index
    %c6_96 = arith.constant 6 : index
    %249 = vector.load %arg2[%c0_95, %c6_96] : memref<2x8xf32, #tpu.memory_space<vmem>>, vector<2x1xf32>
    %cst_97 = arith.constant 5.000000e-01 : f32
    %250 = vector.broadcast %cst_97 : f32 to vector<2x1xf32>
    %251 = arith.mulf %250, %248 : vector<2x1xf32>
    %252 = math.exp %251 : vector<2x1xf32>
    %253 = arith.mulf %249, %252 : vector<2x1xf32>
    %254 = arith.addf %247, %253 : vector<2x1xf32>
    %c0_98 = arith.constant 0 : index
    %c6_99 = arith.constant 6 : index
    %255 = vector.load %arg9[%c0_98, %c6_99] : memref<2x8xf32, #tpu.memory_space<vmem>>, vector<2x1xf32>
    tpu.vector_store %arg9[%c0_98, %c6_99], %247 {strides = array<i32>} : memref<2x8xf32, #tpu.memory_space<vmem>>, vector<2x1xf32>,
    %c0_100 = arith.constant 0 : index
    %c6_101 = arith.constant 6 : index
    %256 = vector.load %arg10[%c0_100, %c6_101] : memref<2x8xf32, #tpu.memory_space<vmem>>, vector<2x1xf32>
    tpu.vector_store %arg10[%c0_100, %c6_101], %248 {strides = array<i32>} : memref<2x8xf32, #tpu.memory_space<vmem>>, vector<2x1xf32>,
    %c0_102 = arith.constant 0 : index
    %c6_103 = arith.constant 6 : index
    %257 = vector.load %arg11[%c0_102, %c6_103] : memref<2x8xf32, #tpu.memory_space<vmem>>, vector<2x1xf32>
    tpu.vector_store %arg11[%c0_102, %c6_103], %254 {strides = array<i32>} : memref<2x8xf32, #tpu.memory_space<vmem>>, vector<2x1xf32>,
    %c0_104 = arith.constant 0 : index
    %c7 = arith.constant 7 : index
    %258 = vector.load %arg1[%c0_104, %c7] : memref<2x8xf32, #tpu.memory_space<vmem>>, vector<2x1xf32>
    %259 = tpu.concatenate %254, %258, %243 in 1 : vector<2x1xf32>, vector<2x1xf32>, vector<2x32xf32> -> vector<2x34xf32>
    %cst_105 = arith.constant dense<0.000000e+00> : vector<2x128xf32>
    %260 = tpu.matmul %259, %0, %cst_105 {dimension_numbers = #tpu.dot_dimension_numbers<[1], [0], [0], [1], [0, 0, 1, 1], [], []>} : vector<2x34xf32>, vector<34x128xf32>, vector<2x128xf32> -> vector<2x128xf32>
    %261 = vector.broadcast %1 : vector<1x128xf32> to vector<2x128xf32>
    %262 = arith.addf %260, %261 : vector<2x128xf32>
    %263 = math.tanh %262 : vector<2x128xf32>
    %264 = arith.negf %262 : vector<2x128xf32>
    %265 = math.exp %264 : vector<2x128xf32>
    %cst_106 = arith.constant 1.000000e+00 : f32
    %266 = vector.broadcast %cst_106 : f32 to vector<2x128xf32>
    %267 = arith.addf %266, %265 : vector<2x128xf32>
    %268 = arith.divf %266, %267 : vector<2x128xf32>
    %269 = arith.select %9, %263, %268 : vector<2x128xi1>, vector<2x128xf32>
    %270 = vector.extract_strided_slice %269 {offsets = [0, 0], sizes = [2, 32], strides = [1, 1]} : vector<2x128xf32> to vector<2x32xf32>
    %271 = vector.extract_strided_slice %269 {offsets = [0, 32], sizes = [2, 32], strides = [1, 1]} : vector<2x128xf32> to vector<2x32xf32>
    %272 = vector.extract_strided_slice %269 {offsets = [0, 64], sizes = [2, 32], strides = [1, 1]} : vector<2x128xf32> to vector<2x32xf32>
    %273 = vector.extract_strided_slice %269 {offsets = [0, 96], sizes = [2, 32], strides = [1, 1]} : vector<2x128xf32> to vector<2x32xf32>
    %274 = arith.mulf %271, %241 : vector<2x32xf32>
    %275 = arith.mulf %270, %272 : vector<2x32xf32>
    %276 = arith.addf %274, %275 : vector<2x32xf32>
    %277 = math.tanh %276 : vector<2x32xf32>
    %278 = arith.mulf %273, %277 : vector<2x32xf32>
    %cst_107 = arith.constant dense<0.000000e+00> : vector<2x2xf32>
    %279 = tpu.matmul %278, %2, %cst_107 {dimension_numbers = #tpu.dot_dimension_numbers<[1], [0], [0], [1], [0, 0, 1, 1], [], []>} : vector<2x32xf32>, vector<32x2xf32>, vector<2x2xf32> -> vector<2x2xf32>
    %280 = vector.broadcast %3 : vector<1x2xf32> to vector<2x2xf32>
    %281 = arith.addf %279, %280 : vector<2x2xf32>
    %282 = vector.extract_strided_slice %281 {offsets = [0, 0], sizes = [2, 1], strides = [1, 1]} : vector<2x2xf32> to vector<2x1xf32>
    %283 = vector.extract_strided_slice %281 {offsets = [0, 1], sizes = [2, 1], strides = [1, 1]} : vector<2x2xf32> to vector<2x1xf32>
    %c0_108 = arith.constant 0 : index
    %c7_109 = arith.constant 7 : index
    %284 = vector.load %arg2[%c0_108, %c7_109] : memref<2x8xf32, #tpu.memory_space<vmem>>, vector<2x1xf32>
    %cst_110 = arith.constant 5.000000e-01 : f32
    %285 = vector.broadcast %cst_110 : f32 to vector<2x1xf32>
    %286 = arith.mulf %285, %283 : vector<2x1xf32>
    %287 = math.exp %286 : vector<2x1xf32>
    %288 = arith.mulf %284, %287 : vector<2x1xf32>
    %289 = arith.addf %282, %288 : vector<2x1xf32>
    %c0_111 = arith.constant 0 : index
    %c7_112 = arith.constant 7 : index
    %290 = vector.load %arg9[%c0_111, %c7_112] : memref<2x8xf32, #tpu.memory_space<vmem>>, vector<2x1xf32>
    tpu.vector_store %arg9[%c0_111, %c7_112], %282 {strides = array<i32>} : memref<2x8xf32, #tpu.memory_space<vmem>>, vector<2x1xf32>,
    %c0_113 = arith.constant 0 : index
    %c7_114 = arith.constant 7 : index
    %291 = vector.load %arg10[%c0_113, %c7_114] : memref<2x8xf32, #tpu.memory_space<vmem>>, vector<2x1xf32>
    tpu.vector_store %arg10[%c0_113, %c7_114], %283 {strides = array<i32>} : memref<2x8xf32, #tpu.memory_space<vmem>>, vector<2x1xf32>,
    %c0_115 = arith.constant 0 : index
    %c7_116 = arith.constant 7 : index
    %292 = vector.load %arg11[%c0_115, %c7_116] : memref<2x8xf32, #tpu.memory_space<vmem>>, vector<2x1xf32>
    tpu.vector_store %arg11[%c0_115, %c7_116], %289 {strides = array<i32>} : memref<2x8xf32, #tpu.memory_space<vmem>>, vector<2x1xf32>,
    return
  }
}

</mosaic_0001>

<bundles_post_ra>
// kernel: tpu_custom_call.1
= control target key start
LH: loop header
LB: loop body
LE: loop exit
PB: predicated region body
PF: predicated region fallthrough
CT: control target
= control target key end

     0   :  { %17 = vsyncpa [#allocation3], 0  ;;  %s2008_s0 = inlined_call_operand.vmem [shape: f32[2,1], index: 0, kind: input, shape index: {}]   ;;  %s2009_s1 = inlined_call_operand.hbm [shape: f32[2,8], index: 1, kind: input, shape index: {}]   ;;  %s2010_s2 = inlined_call_operand.hbm [shape: f32[2,8], index: 2, kind: input, shape index: {}]   ;;  %s2011_s3 = inlined_call_operand.hbm [shape: f32[2,32], index: 3, kind: input, shape index: {}]   ;;  %s2012_s4 = inlined_call_operand.hbm [shape: f32[2,32], index: 4, kind: input, shape index: {}]   ;;  %s2013_s5 = inlined_call_operand.vmem [shape: f32[34,128], index: 5, kind: input, shape index: {}]   ;;  %s2014_s6 = inlined_call_operand.hbm [shape: f32[1,128], index: 6, kind: input, shape index: {}]   ;;  %s2015_s7 = inlined_call_operand.vmem [shape: f32[32,2], index: 7, kind: input, shape index: {}]   ;;  %s2016_s8 = inlined_call_operand.vmem [shape: f32[1,2], index: 8, kind: input, shape index: {}]   ;;  %s2017_s9 = inlined_call_operand.hbm [shape: f32[2,8], index: 9, kind: output, shape index: {0}]   ;;  %s2018_s10 = inlined_call_operand.hbm [shape: f32[2,8], index: 10, kind: output, shape index: {1}]   ;;  %s2019_s11 = inlined_call_operand.hbm [shape: f32[2,8], index: 11, kind: output, shape index: {2}]  }
   0x1   :  { %18 = vsyncpa [#allocation6], 0 }
   0x2   :  { %19 = vsyncpa [#allocation9], 0 }
   0x3   :  { %20 = vsyncpa [#allocation4], 0  ;;  %s40_s19 = sshll.u32 %s2010_s2, 4  ;;  %s41_s19 = int_to_ptr.hbm [resolvable:$true] %s40_s19 }
   0x4   :  { %21 = vsyncpa [#allocation13], 0  ;;  %s1512_s20 = smov [#allocation5]   ;;  %s62_s24 = sshll.u32 %s2012_s4, 4  ;;  %s63_s24 = int_to_ptr.hbm [resolvable:$true] %s62_s24 }
   0x5   :  { %s42_s21 = sshll.u32 %s1512_s20, 4  ;;  %s1513_s25 = smov [#allocation8]   ;;  %s43_s21 = int_to_ptr.vmem [resolvable:$true] %s42_s21 }
   0x6   :  { %45 = dma.hbm_to_vmem [thread:$0]  %s41_s19, 32, %s43_s21, [#allocation6]  }
   0x7   :  { %s64_s26 = sshll.u32 %s1513_s25, 4  ;;  %s29_s29 = sshll.u32 %s2009_s1, 4  ;;  %s65_s26 = int_to_ptr.vmem [resolvable:$true] %s64_s26  ;;  %s30_s29 = int_to_ptr.hbm [resolvable:$true] %s29_s29 }
   0x8   :  { %67 = dma.hbm_to_vmem [thread:$0]  %s63_s24, 32, %s65_s26, [#allocation9]  }
   0x9   :  { %s51_s12 = sshll.u32 %s2011_s3, 4  ;;  %s1514_s13 = smov [#allocation2]   ;;  %s52_s12 = int_to_ptr.hbm [resolvable:$true] %s51_s12 }
   0xa   :  { %s31_s14 = sshll.u32 %s1514_s13, 4  ;;  %s1515_s4 = smov [#allocation7]   ;;  %s32_s14 = int_to_ptr.vmem [resolvable:$true] %s31_s14 }
   0xb   :  { %34 = dma.hbm_to_vmem [thread:$0]  %s30_s29, 32, %s32_s14, [#allocation3]  }
   0xc   :  { %s53_s15 = sshll.u32 %s1515_s4, 4  ;;  %s75_s18 = sshll.u32 %s2014_s6, 4  ;;  %s54_s15 = int_to_ptr.vmem [resolvable:$true] %s53_s15  ;;  %s76_s18 = int_to_ptr.hbm [resolvable:$true] %s75_s18 }
   0xd   :  { %56 = dma.hbm_to_vmem [thread:$0]  %s52_s12, 32, %s54_s15, [#allocation6]  }
   0xe   :  { %s1516_s1 = smov [#allocation10]  }
   0xf   :  { %s77_s19 = sshll.u32 %s1516_s1, 4  ;;  %s78_s19 = int_to_ptr.vmem [resolvable:$true] %s77_s19 }
  0x10   :  { %80 = dma.hbm_to_vmem [thread:$0]  %s76_s18, 16, %s78_s19, [#allocation9]  }
  0x11   :  { %1502 = dma.done.wait [#allocation3], 32  }
  0x12   :  { %1503 = vsyncadd [#allocation3], 4294967264 }
  0x13   :  { %1504 = dma.done.wait [#allocation6], 64  }
  0x14   :  { %1505 = vsyncadd [#allocation6], 4294967232 }
  0x15   :  { %1506 = dma.done.wait [#allocation9], 48  }
  0x16   :  { %1507 = vsyncadd [#allocation9], 4294967248  ;;  %v124_v0 = vld [vmem:[#allocation2] sm:$0x3]  ;;  %s1517_s3 = smov 1   ;;  %s1518_s20 = smov 2   ;;  %v116_v18 = vlaneseq }
  0x17   :  { %126 = vrot.lane.b32.xlu0 %v124_v0, %s1517_s3  ;;  %v121_v1 = vld [vmem:[#allocation7] sm:$0x3]  ;;  %v1617_v2 = vld [vmem:[%s2013_s5 + $0x20] sm:$0x3]  ;;  %vm144_vm0 = vcmask 1041408   ;;  %v1624_v3 = vld [vmem:[%s2013_s5 + $0x18] sm:$0xff] }
  0x18   :  { %1171 = vmatpush.msk.msra.mxu0 %vm144_vm0, %v1617_v2  ;;  %1175 = vmatpush.msk.msra.mxu2 %vm144_vm0, %v1617_v2  ;;  %v1631_v4 = vld [vmem:[%s2013_s5 + $0x10] sm:$0xff]  ;;  %v1638_v5 = vld [vmem:[%s2013_s5 + $0x8] sm:$0xff]  ;;  %v1647_v6 = vld [vmem:[%s2013_s5] sm:$0xff]  ;;  %vm133_vm1 = vcmask 7168   ;;  %vm135_vm2 = vcmask 15360   ;;  %vm140_vm3 = vcmask 277504  }
  0x19   :  { %v123_v8 = vld [vmem:[%s2008_s0] sm:$0x3]  ;;  %v1663_v12 = vld [vmem:[#allocation10] ss:$0 sm:$0xff]  ;;  %v117_v20 = vand.u32 127, %v116_v18  ;;  %s1519_s0 = smov 64  }
  0x1a   :  { %160 = vmatpush.msra.mxu0 %v1624_v3  ;;  %278 = vmatpush.msra.mxu2 %v1624_v3  ;;  %v122_v33 = vld [vmem:[#allocation8] sm:$0x3]  ;;  %s1520_s30 = smov 32   ;;  %s1521_s12 = smov 34   ;;  %v1684_v43 = vld [vmem:[%s2015_s7 + $0x18] sm:$0xff]  ;;  %v1689_v44 = vld [vmem:[%s2015_s7 + $0x10] sm:$0xff] }
  0x1b   :  { %vm118_vm4 = vcmp.ge.s32.totalorder %v117_v20, 64  ;;  %vm119_vm5 = vcmp.lt.s32.totalorder %v117_v20, 96  ;;  %231 = vmatpush.msra.mxu1 %v1684_v43  ;;  %341 = vmatpush.msra.mxu3 %v1684_v43  ;;  %v1696_v45 = vld [vmem:[%s2015_s7 + $0x8] sm:$0xff]  ;;  %v1705_v46 = vld [vmem:[%s2015_s7] sm:$0xff]  ;;  %vm216_vm11 = vcmask 261120   ;;  %vm249_vm12 = vcmask 1024  }
  0x1c   :  { %161 = vmatpush.msra.mxu0 %v1631_v4  ;;  %279 = vmatpush.msra.mxu2 %v1631_v4  ;;  %vm1666_vm7 = vmand %vm118_vm4, %vm119_vm5  ;;  %v1735_v48 = vld [vmem:[%s2016_s8] ss:$0 sm:$0xff]  ;;  %s1522_s6 = smov 127   ;;  %v239_v54 = vld [vmem:[#allocation5] sm:$0x3]  ;;  %s1523_s8 = smov 126  }
  0x1d   :  { %232 = vmatpush.msra.mxu1 %v1689_v44  ;;  %342 = vmatpush.msra.mxu3 %v1689_v44  ;;  %v257_v57 = vld [vmem:[#allocation2] sm:$0x3]  ;;  %s1524_s21 = smov 125   ;;  %s1525_s22 = smov 3  }
  0x1e   :  { %162 = vmatpush.msra.mxu0 %v1638_v5  ;;  %280 = vmatpush.msra.mxu2 %v1638_v5  ;;  %s1526_s23 = smov 124   ;;  %s1527_s24 = smov 4  }
  0x1f   :  { %130 = vrot.lane.b32.xlu0 %v121_v1, %s1518_s20  ;;  %233 = vmatpush.msra.mxu1 %v1696_v45  ;;  %s1528_s25 = smov 123   ;;  %s1529_s26 = smov 122  }
  0x20   :  { %163 = vmatpush.msra.mxu0 %v1647_v6  ;;  %281 = vmatpush.msra.mxu2 %v1647_v6  ;;  %s1530_s27 = smov 5   ;;  %s1531_s28 = smov 6  }
  0x21   :  { %343 = vmatpush.msra.mxu3 %v1696_v45  ;;  %234 = vmatpush.msra.mxu1 %v1705_v46  ;;  %s1532_s29 = smov 7   ;;  %s1128_s14 = sshll.u32 %s2017_s9, 4  ;;  %s1129_s14 = int_to_ptr.hbm [resolvable:$true] %s1128_s14 }
  0x22   :  { %1183 = vmatpush.msk.msrb.mxu0 %vm144_vm0, %v1617_v2  ;;  %584 = vmatpush.msrb.mxu2 %v1684_v43  ;;  %s1535_s4 = smov [#allocation11]   ;;  %s1536_s9 = smov [#allocation14]  }
  0x23   :  { %344 = vmatpush.msra.mxu3 %v1705_v46  ;;  %1179 = vmatpush.msk.msrb.mxu1 %vm144_vm0, %v1617_v2  ;;  %s1126_s15 = sshll.u32 %s1535_s4, 4  ;;  %s1150_s18 = sshll.u32 %s2019_s11, 4  ;;  %s1127_s15 = int_to_ptr.vmem [resolvable:$true] %s1126_s15  ;;  %s1151_s18 = int_to_ptr.hbm [resolvable:$true] %s1150_s18 }
  0x24   :  { %521 = vmatpush.msrb.mxu0 %v1624_v3  ;;  %585 = vmatpush.msrb.mxu2 %v1689_v44 }
  0x25   :  { %459 = vmatpush.msrb.mxu3 %v1684_v43  ;;  %396 = vmatpush.msrb.mxu1 %v1624_v3 }
  0x26   :  { %522 = vmatpush.msrb.mxu0 %v1631_v4  ;;  %586 = vmatpush.msrb.mxu2 %v1696_v45 }
  0x27   :  { %460 = vmatpush.msrb.mxu3 %v1689_v44  ;;  %397 = vmatpush.msrb.mxu1 %v1631_v4 }
  0x28   :  { %523 = vmatpush.msrb.mxu0 %v1638_v5  ;;  %587 = vmatpush.msrb.mxu2 %v1705_v46 }
  0x29   :  { %461 = vmatpush.msrb.mxu3 %v1696_v45  ;;  %398 = vmatpush.msrb.mxu1 %v1638_v5 }
  0x2a   :  { %524 = vmatpush.msrb.mxu0 %v1647_v6 }
  0x2b   :  { %462 = vmatpush.msrb.mxu3 %v1705_v46  ;;  %399 = vmatpush.msrb.mxu1 %v1647_v6 }
  0x89   :  { %v127_v7 = vpop.permute.xlu0 %126 }
  0x8a   :  { %v134_v9 = vsel %vm133_vm1, %v123_v8, %v127_v7 }
  0x91   :  { %v131_v10 = vpop.permute.xlu0 %130 }
  0x92   :  { %v136_v11 = vsel %vm135_vm2, %v134_v9, %v131_v10 }
  0x93   :  { %1172 = vmatmul.msk.f32.vlgmr.msra.gmra.mxu0 %vm140_vm3, %v136_v11 }
  0x94   :  { %834 = vmatpush.msra.mxu0 %v1684_v43 }
  0x96   :  { %835 = vmatpush.msra.mxu0 %v1689_v44 }
  0x98   :  { %836 = vmatpush.msra.mxu0 %v1696_v45 }
  0x9a   :  { %837 = vmatpush.msra.mxu0 %v1705_v46 }
 0x110   :  { %v165_v13 = vpop.f32.mrf.mxu0 }
 0x111   :  { %v166_v14 = vadd.f32 %v1663_v12, %v165_v13 }
 0x113   :  { %v1173_v15 = vmul.f32 -1.442695, %v166_v14 }
 0x115   :  { %1230 = vpow2.f32 %v1173_v15 }
 0x11b   :  { %v1231_v16 = vpop.eup %1230 }
 0x11c   :  { %v172_v17 = vadd.f32 1.0, %v1231_v16 }
 0x11e   :  { %1232 = vrcp.f32 %v172_v17  ;;  %v184_v23 = vand.u32 2147483648, %v172_v17  ;;  %v182_v25 = vand.u32 2147483647, %v172_v17  ;;  %vm178_vm8 = vweird.f32 %v172_v17 }
 0x11f   :  { %1234 = vtanh.f32 %v166_v14 }
 0x120   :  { %v185_v28 = vor.u32 1.1754944e-38, %v184_v23  ;;  %vm183_vm10 = vcmp.eq.f32.partialorder %v182_v25, 8.507059e+37 }
 0x124   :  { %v1233_v19 = vpop.eup %1232 }
 0x125   :  { %v174_v21 = vmul.f32 %v1233_v19, %v172_v17  ;;  %vm179_vm6 = vweird.f32 %v1233_v19  ;;  %v1235_v30 = vpop.eup %1234 }
 0x126   :  { %vm180_vm9 = vmor %vm178_vm8, %vm179_vm6 }
 0x127   :  { %v175_v22 = vsub.f32 1.0, %v174_v21 }
 0x129   :  { %v176_v24 = vmul.f32 %v1233_v19, %v175_v22 }
 0x12b   :  { %v177_v27 = vadd.f32 %v1233_v19, %v176_v24 }
 0x12d   :  { %v181_v29 = vsel %vm180_vm9, %v1233_v19, %v177_v27 }
 0x12e   :  { %v186_v31 = vsel %vm183_vm10, %v185_v28, %v181_v29 }
 0x12f   :  { %v188_v32 = vsel %vm1666_vm7, %v1235_v30, %v186_v31  ;;  %v371_v31 = vld [vmem:[#allocation2] sm:$0x3] }
 0x130   :  { %195 = vrot.lane.b32.xlu1 %v188_v32, %s1519_s0 }
 0x138   :  { %190 = vrot.lane.b32.xlu1 %v122_v33, %s1520_s30 }
 0x1a2   :  { %v196_v34 = vpop.permute.xlu1 %195 }
 0x1a3   :  { %v198_v35 = vmul.f32 %v196_v34, %v188_v32 }
 0x1a5   :  { %200 = vrot.lane.b32.xlu2 %v198_v35, %s1520_s30 }
 0x1aa   :  { %v191_v36 = vpop.permute.xlu1 %190 }
 0x1ab   :  { %v193_v37 = vmul.f32 %v191_v36, %v188_v32  ;;  %v349_v36 = vld [vmem:[#allocation5] sm:$0x3] }
 0x1ff   :  { %v201_v38 = vpop.permute.xlu2 %200 }
 0x200   :  { %v1675_v39 = vadd.f32 %v201_v38, %v193_v37 }
 0x202   :  { %1236 = vtanh.f32 %v1675_v39 }
 0x208   :  { %v1237_v40 = vpop.eup %1236 }
 0x209   :  { %206 = vrot.lane.b32.xlu2 %v1237_v40, %s1519_s0 }
 0x263   :  { %v207_v41 = vpop.permute.xlu2 %206 }
 0x264   :  { %v209_v42 = vmul.f32 %v207_v41, %v188_v32 }
 0x266   :  { %258 = vrot.lane.b32.xlu2 %v209_v42, %s1521_s12  ;;  %214 = vrot.lane.b32.xlu0 %v209_v42, %s1520_s30 }
 0x2c0   :  { %v259_v59 = vpop.permute.xlu2 %258 }
 0x2d8   :  { %v215_v47 = vpop.permute.xlu0 %214 }
 0x2d9   :  { %1174 = vmatmul.msk.f32.vlgmr.msra.gmra.mxu1 %vm216_vm11, %v215_v47 }
 0x2da   :  { %709 = vmatpush.msra.mxu1 %v1684_v43 }
 0x2dc   :  { %710 = vmatpush.msra.mxu1 %v1689_v44 }
 0x2de   :  { %711 = vmatpush.msra.mxu1 %v1696_v45 }
 0x2e0   :  { %712 = vmatpush.msra.mxu1 %v1705_v46 }
 0x356   :  { %v236_v49 = vpop.f32.mrf.mxu1 }
 0x357   :  { %v1738_v50 = vadd.f32 %v1735_v48, %v236_v49 }
 0x359   :  { %v240_v51 = vmul.f32 0.5, %v1738_v50  ;;  %250 = vst.msk [vmem:[#allocation11] sm:$0x3] %vm249_vm12, %v1738_v50 }
 0x35b   :  { %v241_v52 = vmul.f32 1.442695, %v240_v51 }
 0x35d   :  { %1238 = vpow2.f32 %v241_v52 }
 0x363   :  { %v1239_v53 = vpop.eup %1238 }
 0x364   :  { %244 = vrot.lane.b32.xlu1 %v1239_v53, %s1522_s6 }
 0x3d6   :  { %v245_v55 = vpop.permute.xlu1 %244 }
 0x3d7   :  { %v247_v56 = vmul.f32 %v245_v55, %v239_v54 }
 0x3d9   :  { %v248_v58 = vadd.f32 %v247_v56, %v1738_v50 }
 0x3db   :  { %v261_v60 = vsel %vm133_vm1, %v248_v58, %v257_v57  ;;  %256 = vst.msk [vmem:[#allocation14] sm:$0x3] %vm249_vm12, %v248_v58 }
 0x3dc   :  { %v262_v61 = vsel %vm135_vm2, %v261_v60, %v259_v59 }
 0x3dd   :  { %1176 = vmatmul.msk.f32.vlgmr.msra.gmra.mxu2 %vm140_vm3, %v262_v61 }
 0x3de   :  { %1191 = vmatpush.msk.msra.mxu2 %vm144_vm0, %v1617_v2 }
 0x3e0   :  { %771 = vmatpush.msra.mxu2 %v1624_v3 }
 0x3e2   :  { %772 = vmatpush.msra.mxu2 %v1631_v4 }
 0x3e4   :  { %773 = vmatpush.msra.mxu2 %v1638_v5 }
 0x3e6   :  { %774 = vmatpush.msra.mxu2 %v1647_v6 }
 0x460   :  { %v283_v62 = vpop.f32.mrf.mxu2 }
 0x461   :  { %v284_v63 = vadd.f32 %v1663_v12, %v283_v62 }
 0x463   :  { %v1177_v0 = vmul.f32 -1.442695, %v284_v63 }
 0x465   :  { %1240 = vpow2.f32 %v1177_v0 }
 0x46b   :  { %v1241_v1 = vpop.eup %1240 }
 0x46c   :  { %v290_v7 = vadd.f32 1.0, %v1241_v1 }
 0x46e   :  { %1242 = vrcp.f32 %v290_v7  ;;  %v302_v11 = vand.u32 2147483648, %v290_v7  ;;  %v300_v14 = vand.u32 2147483647, %v290_v7  ;;  %vm296_vm14 = vweird.f32 %v290_v7 }
 0x46f   :  { %1244 = vtanh.f32 %v284_v63 }
 0x470   :  { %v303_v16 = vor.u32 1.1754944e-38, %v302_v11  ;;  %vm301_vm4 = vcmp.eq.f32.partialorder %v300_v14, 8.507059e+37 }
 0x474   :  { %v1243_v8 = vpop.eup %1242 }
 0x475   :  { %v292_v9 = vmul.f32 %v1243_v8, %v290_v7  ;;  %vm297_vm13 = vweird.f32 %v1243_v8  ;;  %v1245_v18 = vpop.eup %1244 }
 0x476   :  { %vm298_vm15 = vmor %vm296_vm14, %vm297_vm13 }
 0x477   :  { %v293_v10 = vsub.f32 1.0, %v292_v9 }
 0x479   :  { %v294_v13 = vmul.f32 %v1243_v8, %v293_v10 }
 0x47b   :  { %v295_v15 = vadd.f32 %v1243_v8, %v294_v13 }
 0x47d   :  { %v299_v17 = vsel %vm298_vm15, %v1243_v8, %v295_v15 }
 0x47e   :  { %v304_v19 = vsel %vm301_vm4, %v303_v16, %v299_v17 }
 0x47f   :  { %v306_v20 = vsel %vm1666_vm7, %v1245_v18, %v304_v19 }
 0x480   :  { %309 = vrot.lane.b32.xlu0 %v306_v20, %s1519_s0  ;;  %v307_v23 = vmul.f32 %v306_v20, %v1675_v39 }
 0x4f2   :  { %v310_v21 = vpop.permute.xlu0 %309 }
 0x4f3   :  { %v312_v22 = vmul.f32 %v310_v21, %v306_v20 }
 0x4f5   :  { %314 = vrot.lane.b32.xlu1 %v312_v22, %s1520_s30 }
 0x567   :  { %v315_v24 = vpop.permute.xlu1 %314 }
 0x568   :  { %v1761_v25 = vadd.f32 %v315_v24, %v307_v23  ;;  %v496_v24 = vld [vmem:[#allocation2] sm:$0x3] }
 0x56a   :  { %1246 = vtanh.f32 %v1761_v25 }
 0x570   :  { %v1247_v27 = vpop.eup %1246 }
 0x571   :  { %320 = vrot.lane.b32.xlu2 %v1247_v27, %s1519_s0 }
 0x579   :  { %373 = vrot.lane.b32.xlu2 %v371_v31, %s1522_s6 }
 0x5cb   :  { %v321_v28 = vpop.permute.xlu2 %320 }
 0x5cc   :  { %v323_v29 = vmul.f32 %v321_v28, %v306_v20 }
 0x5ce   :  { %325 = vrot.lane.b32.xlu0 %v323_v29, %s1520_s30 }
 0x5d3   :  { %v374_v40 = vpop.permute.xlu2 %373 }
 0x5d6   :  { %376 = vrot.lane.b32.xlu0 %v323_v29, %s1521_s12 }
 0x640   :  { %v326_v30 = vpop.permute.xlu0 %325 }
 0x641   :  { %1178 = vmatmul.msk.f32.vlgmr.msra.gmra.mxu3 %vm216_vm11, %v326_v30 }
 0x642   :  { %1187 = vmatpush.msk.msra.mxu3 %vm144_vm0, %v1617_v2 }
 0x644   :  { %646 = vmatpush.msra.mxu3 %v1624_v3 }
 0x646   :  { %647 = vmatpush.msra.mxu3 %v1631_v4 }
 0x648   :  { %648 = vmatpush.msra.mxu3 %v1638_v5  ;;  %v377_v42 = vpop.permute.xlu0 %376 }
 0x64a   :  { %649 = vmatpush.msra.mxu3 %v1647_v6 }
 0x6c4   :  { %v346_v32 = vpop.f32.mrf.mxu3 }
 0x6c5   :  { %v1776_v33 = vadd.f32 %v1735_v48, %v346_v32 }
 0x6c7   :  { %v350_v34 = vmul.f32 0.5, %v1776_v33 }
 0x6c9   :  { %v351_v35 = vmul.f32 1.442695, %v350_v34 }
 0x6cb   :  { %1248 = vpow2.f32 %v351_v35 }
 0x6d1   :  { %v1249_v37 = vpop.eup %1248 }
 0x6d2   :  { %v353_v38 = vmul.f32 %v1249_v37, %v349_v36 }
 0x6d4   :  { %355 = vrot.lane.b32.xlu1 %v353_v38, %s1522_s6 }
 0x746   :  { %v356_v39 = vpop.permute.xlu1 %355 }
 0x747   :  { %v1781_v41 = vadd.f32 %v356_v39, %v1776_v33 }
 0x749   :  { %v379_v47 = vsel %vm133_vm1, %v1781_v41, %v374_v40 }
 0x74a   :  { %v380_v49 = vsel %vm135_vm2, %v379_v47, %v377_v42 }
 0x74b   :  { %1180 = vmatmul.msk.f32.vlgmr.msrb.gmra.mxu1 %vm140_vm3, %v380_v49 }
 0x74c   :  { %1195 = vmatpush.msk.msrb.mxu1 %vm144_vm0, %v1617_v2 }
 0x74e   :  { %896 = vmatpush.msrb.mxu1 %v1624_v3 }
 0x750   :  { %897 = vmatpush.msrb.mxu1 %v1631_v4 }
 0x752   :  { %898 = vmatpush.msrb.mxu1 %v1638_v5 }
 0x754   :  { %899 = vmatpush.msrb.mxu1 %v1647_v6 }
 0x7c8   :  { %v401_v51 = vpop.f32.mrf.mxu1 }
 0x7c9   :  { %v402_v52 = vadd.f32 %v1663_v12, %v401_v51 }
 0x7cb   :  { %v1181_v53 = vmul.f32 -1.442695, %v402_v52 }
 0x7cd   :  { %1250 = vpow2.f32 %v1181_v53 }
 0x7d3   :  { %v1251_v54 = vpop.eup %1250 }
 0x7d4   :  { %v408_v55 = vadd.f32 1.0, %v1251_v54 }
 0x7d6   :  { %1252 = vrcp.f32 %v408_v55  ;;  %v420_v59 = vand.u32 2147483648, %v408_v55  ;;  %v418_v61 = vand.u32 2147483647, %v408_v55  ;;  %vm414_vm6 = vweird.f32 %v408_v55 }
 0x7d7   :  { %1254 = vtanh.f32 %v402_v52 }
 0x7d8   :  { %v421_v63 = vor.u32 1.1754944e-38, %v420_v59  ;;  %vm419_vm9 = vcmp.eq.f32.partialorder %v418_v61, 8.507059e+37 }
 0x7dc   :  { %v1253_v56 = vpop.eup %1252 }
 0x7dd   :  { %v410_v57 = vmul.f32 %v1253_v56, %v408_v55  ;;  %vm415_vm5 = vweird.f32 %v1253_v56  ;;  %v1255_v1 = vpop.eup %1254 }
 0x7de   :  { %vm416_vm8 = vmor %vm414_vm6, %vm415_vm5 }
 0x7df   :  { %v411_v58 = vsub.f32 1.0, %v410_v57 }
 0x7e1   :  { %v412_v60 = vmul.f32 %v1253_v56, %v411_v58 }
 0x7e3   :  { %v413_v62 = vadd.f32 %v1253_v56, %v412_v60 }
 0x7e5   :  { %v417_v0 = vsel %vm416_vm8, %v1253_v56, %v413_v62 }
 0x7e6   :  { %v422_v7 = vsel %vm419_vm9, %v421_v63, %v417_v0  ;;  %v621_v0 = vld [vmem:[#allocation2] sm:$0x3] }
 0x7e7   :  { %v424_v8 = vsel %vm1666_vm7, %v1255_v1, %v422_v7 }
 0x7e8   :  { %427 = vrot.lane.b32.xlu1 %v424_v8, %s1519_s0  ;;  %v425_v11 = vmul.f32 %v424_v8, %v1761_v25  ;;  %v467_v25 = vld [vmem:[#allocation5] sm:$0x3] }
 0x85a   :  { %v428_v9 = vpop.permute.xlu1 %427 }
 0x85b   :  { %v430_v10 = vmul.f32 %v428_v9, %v424_v8 }
 0x85d   :  { %432 = vrot.lane.b32.xlu2 %v430_v10, %s1520_s30 }
 0x8b7   :  { %v433_v13 = vpop.permute.xlu2 %432 }
 0x8b8   :  { %v1799_v14 = vadd.f32 %v433_v13, %v425_v11 }
 0x8ba   :  { %1256 = vtanh.f32 %v1799_v14 }
 0x8c0   :  { %v1257_v15 = vpop.eup %1256 }
 0x8c1   :  { %438 = vrot.lane.b32.xlu0 %v1257_v15, %s1519_s0 }
 0x933   :  { %v439_v16 = vpop.permute.xlu0 %438 }
 0x934   :  { %v441_v17 = vmul.f32 %v439_v16, %v424_v8 }
 0x936   :  { %443 = vrot.lane.b32.xlu1 %v441_v17, %s1520_s30 }
 0x93e   :  { %498 = vrot.lane.b32.xlu1 %v496_v24, %s1523_s8 }
 0x9a8   :  { %v444_v18 = vpop.permute.xlu1 %443 }
 0x9a9   :  { %1182 = vmatmul.msk.f32.vlgmr.msrb.gmra.mxu3 %vm216_vm11, %v444_v18 }
 0x9aa   :  { %959 = vmatpush.msrb.mxu3 %v1684_v43 }
 0x9ac   :  { %960 = vmatpush.msrb.mxu3 %v1689_v44 }
 0x9ae   :  { %961 = vmatpush.msrb.mxu3 %v1696_v45 }
 0x9b0   :  { %962 = vmatpush.msrb.mxu3 %v1705_v46  ;;  %v499_v30 = vpop.permute.xlu1 %498 }
 0xa2c   :  { %v464_v19 = vpop.f32.mrf.mxu3 }
 0xa2d   :  { %v1810_v20 = vadd.f32 %v1735_v48, %v464_v19 }
 0xa2f   :  { %v468_v21 = vmul.f32 0.5, %v1810_v20 }
 0xa31   :  { %v469_v22 = vmul.f32 1.442695, %v468_v21 }
 0xa33   :  { %1258 = vpow2.f32 %v469_v22 }
 0xa39   :  { %v1259_v23 = vpop.eup %1258 }
 0xa3a   :  { %472 = vrot.lane.b32.xlu2 %v1259_v23, %s1517_s3 }
 0xa42   :  { %501 = vrot.lane.b32.xlu2 %v441_v17, %s1521_s12 }
 0xa94   :  { %v473_v27 = vpop.permute.xlu2 %472 }
 0xa95   :  { %v475_v28 = vmul.f32 %v473_v27, %v467_v25 }
 0xa97   :  { %477 = vrot.lane.b32.xlu0 %v475_v28, %s1523_s8 }
 0xa9c   :  { %v502_v32 = vpop.permute.xlu2 %501 }
 0xb09   :  { %v478_v29 = vpop.permute.xlu0 %477 }
 0xb0a   :  { %v1816_v31 = vadd.f32 %v478_v29, %v1810_v20 }
 0xb0c   :  { %v504_v34 = vsel %vm133_vm1, %v1816_v31, %v499_v30 }
 0xb0d   :  { %v505_v35 = vsel %vm135_vm2, %v504_v34, %v502_v32 }
 0xb0e   :  { %1184 = vmatmul.msk.f32.vlgmr.msrb.gmra.mxu0 %vm140_vm3, %v505_v35 }
 0xb0f   :  { %1199 = vmatpush.msk.msrb.mxu0 %vm144_vm0, %v1617_v2 }
 0xb11   :  { %1021 = vmatpush.msrb.mxu0 %v1624_v3 }
 0xb13   :  { %1022 = vmatpush.msrb.mxu0 %v1631_v4 }
 0xb15   :  { %1023 = vmatpush.msrb.mxu0 %v1638_v5 }
 0xb17   :  { %1024 = vmatpush.msrb.mxu0 %v1647_v6 }
 0xb8b   :  { %v526_v36 = vpop.f32.mrf.mxu0 }
 0xb8c   :  { %v527_v37 = vadd.f32 %v1663_v12, %v526_v36 }
 0xb8e   :  { %v1185_v38 = vmul.f32 -1.442695, %v527_v37 }
 0xb90   :  { %1260 = vpow2.f32 %v1185_v38 }
 0xb96   :  { %v1261_v39 = vpop.eup %1260 }
 0xb97   :  { %v533_v40 = vadd.f32 1.0, %v1261_v39 }
 0xb99   :  { %1262 = vrcp.f32 %v533_v40  ;;  %v545_v2 = vand.u32 2147483648, %v533_v40  ;;  %v543_v4 = vand.u32 2147483647, %v533_v40  ;;  %vm539_vm10 = vweird.f32 %v533_v40 }
 0xb9a   :  { %1264 = vtanh.f32 %v527_v37 }
 0xb9b   :  { %v546_v5 = vor.u32 1.1754944e-38, %v545_v2  ;;  %vm544_vm14 = vcmp.eq.f32.partialorder %v543_v4, 8.507059e+37 }
 0xb9f   :  { %v1263_v42 = vpop.eup %1262 }
 0xba0   :  { %v535_v47 = vmul.f32 %v1263_v42, %v533_v40  ;;  %vm540_vm0 = vweird.f32 %v1263_v42  ;;  %v1265_v52 = vpop.eup %1264 }
 0xba1   :  { %vm541_vm13 = vmor %vm539_vm10, %vm540_vm0 }
 0xba2   :  { %v536_v49 = vsub.f32 1.0, %v535_v47 }
 0xba4   :  { %v537_v3 = vmul.f32 %v1263_v42, %v536_v49 }
 0xba6   :  { %v538_v51 = vadd.f32 %v1263_v42, %v537_v3 }
 0xba8   :  { %v542_v6 = vsel %vm541_vm13, %v1263_v42, %v538_v51 }
 0xba9   :  { %v547_v53 = vsel %vm544_vm14, %v546_v5, %v542_v6 }
 0xbaa   :  { %v549_v54 = vsel %vm1666_vm7, %v1265_v52, %v547_v53 }
 0xbab   :  { %552 = vrot.lane.b32.xlu0 %v549_v54, %s1519_s0  ;;  %v550_v57 = vmul.f32 %v549_v54, %v1799_v14 }
 0xc1d   :  { %v553_v55 = vpop.permute.xlu0 %552 }
 0xc1e   :  { %v555_v56 = vmul.f32 %v553_v55, %v549_v54  ;;  %v717_v55 = vld [vmem:[#allocation5] sm:$0x3] }
 0xc20   :  { %557 = vrot.lane.b32.xlu1 %v555_v56, %s1520_s30 }
 0xc92   :  { %v558_v58 = vpop.permute.xlu1 %557 }
 0xc93   :  { %v1834_v59 = vadd.f32 %v558_v58, %v550_v57 }
 0xc95   :  { %1266 = vtanh.f32 %v1834_v59 }
 0xc9b   :  { %v1267_v60 = vpop.eup %1266 }
 0xc9c   :  { %563 = vrot.lane.b32.xlu2 %v1267_v60, %s1519_s0 }
 0xcf6   :  { %v564_v61 = vpop.permute.xlu2 %563 }
 0xcf7   :  { %v566_v62 = vmul.f32 %v564_v61, %v549_v54  ;;  %v746_v54 = vld [vmem:[#allocation2] sm:$0x3] }
 0xcf9   :  { %568 = vrot.lane.b32.xlu0 %v566_v62, %s1520_s30 }
 0xd01   :  { %623 = vrot.lane.b32.xlu0 %v621_v0, %s1524_s21 }
 0xd6b   :  { %v569_v63 = vpop.permute.xlu0 %568 }
 0xd6c   :  { %1186 = vmatmul.msk.f32.vlgmr.msrb.gmra.mxu2 %vm216_vm11, %v569_v63 }
 0xd6d   :  { %1084 = vmatpush.msrb.mxu2 %v1684_v43  ;;  %v592_v43 = vld [vmem:[#allocation5] sm:$0x3] }
 0xd6f   :  { %1085 = vmatpush.msrb.mxu2 %v1689_v44 }
 0xd71   :  { %1086 = vmatpush.msrb.mxu2 %v1696_v45 }
 0xd73   :  { %1087 = vmatpush.msrb.mxu2 %v1705_v46  ;;  %v624_v11 = vpop.permute.xlu0 %623 }
 0xdef   :  { %v589_v1 = vpop.f32.mrf.mxu2 }
 0xdf0   :  { %v1845_v7 = vadd.f32 %v1735_v48, %v589_v1 }
 0xdf2   :  { %v593_v8 = vmul.f32 0.5, %v1845_v7 }
 0xdf4   :  { %v594_v9 = vmul.f32 1.442695, %v593_v8 }
 0xdf6   :  { %1268 = vpow2.f32 %v594_v9 }
 0xdfc   :  { %v1269_v10 = vpop.eup %1268 }
 0xdfd   :  { %597 = vrot.lane.b32.xlu1 %v1269_v10, %s1518_s20 }
 0xe05   :  { %626 = vrot.lane.b32.xlu1 %v566_v62, %s1521_s12 }
 0xe6f   :  { %v598_v44 = vpop.permute.xlu1 %597 }
 0xe70   :  { %v600_v45 = vmul.f32 %v598_v44, %v592_v43 }
 0xe72   :  { %602 = vrot.lane.b32.xlu2 %v600_v45, %s1524_s21 }
 0xe77   :  { %v627_v14 = vpop.permute.xlu1 %626 }
 0xecc   :  { %v603_v46 = vpop.permute.xlu2 %602 }
 0xecd   :  { %v1851_v13 = vadd.f32 %v603_v46, %v1845_v7 }
 0xecf   :  { %v629_v15 = vsel %vm133_vm1, %v1851_v13, %v624_v11 }
 0xed0   :  { %v630_v16 = vsel %vm135_vm2, %v629_v15, %v627_v14 }
 0xed1   :  { %1188 = vmatmul.msk.f32.vlgmr.msra.gmra.mxu3 %vm140_vm3, %v630_v16 }
 0xf54   :  { %v651_v17 = vpop.f32.mrf.mxu3 }
 0xf55   :  { %v652_v18 = vadd.f32 %v1663_v12, %v651_v17 }
 0xf57   :  { %v1189_v19 = vmul.f32 -1.442695, %v652_v18 }
 0xf59   :  { %1270 = vpow2.f32 %v1189_v19 }
 0xf5f   :  { %v1271_v21 = vpop.eup %1270 }
 0xf60   :  { %v658_v22 = vadd.f32 1.0, %v1271_v21 }
 0xf62   :  { %1272 = vrcp.f32 %v658_v22  ;;  %v670_v27 = vand.u32 2147483648, %v658_v22  ;;  %v668_v29 = vand.u32 2147483647, %v658_v22  ;;  %vm664_vm4 = vweird.f32 %v658_v22 }
 0xf63   :  { %1274 = vtanh.f32 %v652_v18 }
 0xf64   :  { %v671_v32 = vor.u32 1.1754944e-38, %v670_v27  ;;  %vm669_vm6 = vcmp.eq.f32.partialorder %v668_v29, 8.507059e+37 }
 0xf68   :  { %v1273_v23 = vpop.eup %1272 }
 0xf69   :  { %v660_v24 = vmul.f32 %v1273_v23, %v658_v22  ;;  %vm665_vm15 = vweird.f32 %v1273_v23  ;;  %v1275_v35 = vpop.eup %1274 }
 0xf6a   :  { %vm666_vm5 = vmor %vm664_vm4, %vm665_vm15 }
 0xf6b   :  { %v661_v25 = vsub.f32 1.0, %v660_v24 }
 0xf6d   :  { %v662_v28 = vmul.f32 %v1273_v23, %v661_v25 }
 0xf6f   :  { %v663_v30 = vadd.f32 %v1273_v23, %v662_v28 }
 0xf71   :  { %v667_v34 = vsel %vm666_vm5, %v1273_v23, %v663_v30 }
 0xf72   :  { %v672_v36 = vsel %vm669_vm6, %v671_v32, %v667_v34  ;;  %vm735_vm6 = vcmask 33824  }
 0xf73   :  { %v674_v37 = vsel %vm1666_vm7, %v1275_v35, %v672_v36 }
 0xf74   :  { %677 = vrot.lane.b32.xlu2 %v674_v37, %s1519_s0  ;;  %v675_v40 = vmul.f32 %v674_v37, %v1834_v59 }
 0xfce   :  { %v678_v38 = vpop.permute.xlu2 %677 }
 0xfcf   :  { %v680_v39 = vmul.f32 %v678_v38, %v674_v37 }
 0xfd1   :  { %682 = vrot.lane.b32.xlu0 %v680_v39, %s1520_s30  ;;  %v871_v39 = vld [vmem:[#allocation2] sm:$0x3] }
0x1043   :  { %v683_v42 = vpop.permute.xlu0 %682 }
0x1044   :  { %v685_v47 = vadd.f32 %v683_v42, %v675_v40  ;;  %v842_v40 = vld [vmem:[#allocation5] sm:$0x3] }
0x1046   :  { %1276 = vtanh.f32 %v685_v47 }
0x104c   :  { %v1277_v49 = vpop.eup %1276 }
0x104d   :  { %688 = vrot.lane.b32.xlu1 %v1277_v49, %s1519_s0 }
0x10bf   :  { %v689_v2 = vpop.permute.xlu1 %688 }
0x10c0   :  { %v691_v3 = vmul.f32 %v689_v2, %v674_v37 }
0x10c2   :  { %693 = vrot.lane.b32.xlu2 %v691_v3, %s1520_s30 }
0x10ca   :  { %748 = vrot.lane.b32.xlu2 %v746_v54, %s1526_s23 }
0x111c   :  { %v694_v4 = vpop.permute.xlu2 %693 }
0x111d   :  { %1190 = vmatmul.msk.f32.vlgmr.msra.gmra.mxu1 %vm216_vm11, %v694_v4 }
0x1124   :  { %v749_v59 = vpop.permute.xlu2 %748 }
0x119a   :  { %v714_v51 = vpop.f32.mrf.mxu1 }
0x119b   :  { %v1867_v5 = vadd.f32 %v1735_v48, %v714_v51 }
0x119d   :  { %v718_v6 = vmul.f32 0.5, %v1867_v5 }
0x119f   :  { %v719_v52 = vmul.f32 1.442695, %v718_v6 }
0x11a1   :  { %1278 = vpow2.f32 %v719_v52 }
0x11a7   :  { %v1279_v53 = vpop.eup %1278 }
0x11a8   :  { %722 = vrot.lane.b32.xlu0 %v1279_v53, %s1525_s22 }
0x11b0   :  { %751 = vrot.lane.b32.xlu0 %v691_v3, %s1521_s12 }
0x121a   :  { %v723_v56 = vpop.permute.xlu0 %722 }
0x121b   :  { %v725_v57 = vmul.f32 %v723_v56, %v717_v55 }
0x121d   :  { %727 = vrot.lane.b32.xlu1 %v725_v57, %s1526_s23 }
0x1222   :  { %v752_v61 = vpop.permute.xlu0 %751 }
0x128f   :  { %v728_v58 = vpop.permute.xlu1 %727 }
0x1290   :  { %v1873_v60 = vadd.f32 %v728_v58, %v1867_v5 }
0x1292   :  { %v754_v62 = vsel %vm133_vm1, %v1873_v60, %v749_v59 }
0x1293   :  { %v755_v63 = vsel %vm135_vm2, %v754_v62, %v752_v61 }
0x1294   :  { %1192 = vmatmul.msk.f32.vlgmr.msra.gmra.mxu2 %vm140_vm3, %v755_v63 }
0x1317   :  { %v776_v0 = vpop.f32.mrf.mxu2 }
0x1318   :  { %v777_v1 = vadd.f32 %v1663_v12, %v776_v0 }
0x131a   :  { %v1193_v8 = vmul.f32 -1.442695, %v777_v1 }
0x131c   :  { %1280 = vpow2.f32 %v1193_v8 }
0x1322   :  { %v1281_v9 = vpop.eup %1280 }
0x1323   :  { %v783_v10 = vadd.f32 1.0, %v1281_v9 }
0x1325   :  { %1282 = vrcp.f32 %v783_v10  ;;  %v795_v46 = vand.u32 2147483648, %v783_v10  ;;  %v793_v14 = vand.u32 2147483647, %v783_v10  ;;  %vm789_vm9 = vweird.f32 %v783_v10 }
0x1326   :  { %1284 = vtanh.f32 %v777_v1 }
0x1327   :  { %v796_v16 = vor.u32 1.1754944e-38, %v795_v46  ;;  %vm794_vm10 = vcmp.eq.f32.partialorder %v793_v14, 8.507059e+37 }
0x132b   :  { %v1283_v43 = vpop.eup %1282 }
0x132c   :  { %v785_v44 = vmul.f32 %v1283_v43, %v783_v10  ;;  %vm790_vm8 = vweird.f32 %v1283_v43  ;;  %v1285_v18 = vpop.eup %1284 }
0x132d   :  { %vm791_vm0 = vmor %vm789_vm9, %vm790_vm8  ;;  %vm860_vm8 = vcmask 42024   ;;  %vm985_vm9 = vcmask 50224  }
0x132e   :  { %v786_v45 = vsub.f32 1.0, %v785_v44 }
0x1330   :  { %v787_v11 = vmul.f32 %v1283_v43, %v786_v45 }
0x1332   :  { %v788_v15 = vadd.f32 %v1283_v43, %v787_v11 }
0x1334   :  { %v792_v17 = vsel %vm791_vm0, %v1283_v43, %v788_v15  ;;  %vm1110_vm0 = vcmask 58424  }
0x1335   :  { %v797_v19 = vsel %vm794_vm10, %v796_v16, %v792_v17 }
0x1336   :  { %v799_v21 = vsel %vm1666_vm7, %v1285_v18, %v797_v19  ;;  %v996_v19 = vld [vmem:[#allocation2] sm:$0x3] }
0x1337   :  { %802 = vrot.lane.b32.xlu1 %v799_v21, %s1519_s0  ;;  %v800_v24 = vmul.f32 %v799_v21, %v685_v47 }
0x13a9   :  { %v803_v22 = vpop.permute.xlu1 %802 }
0x13aa   :  { %v805_v23 = vmul.f32 %v803_v22, %v799_v21 }
0x13ac   :  { %807 = vrot.lane.b32.xlu2 %v805_v23, %s1520_s30 }
0x1406   :  { %v808_v25 = vpop.permute.xlu2 %807 }
0x1407   :  { %v810_v27 = vadd.f32 %v808_v25, %v800_v24 }
0x1409   :  { %1286 = vtanh.f32 %v810_v27 }
0x140f   :  { %v1287_v28 = vpop.eup %1286 }
0x1410   :  { %813 = vrot.lane.b32.xlu0 %v1287_v28, %s1519_s0 }
0x1482   :  { %v814_v29 = vpop.permute.xlu0 %813 }
0x1483   :  { %v816_v30 = vmul.f32 %v814_v29, %v799_v21 }
0x1485   :  { %818 = vrot.lane.b32.xlu1 %v816_v30, %s1520_s30 }
0x148d   :  { %873 = vrot.lane.b32.xlu1 %v871_v39, %s1528_s25 }
0x14f7   :  { %v819_v32 = vpop.permute.xlu1 %818 }
0x14f8   :  { %1194 = vmatmul.msk.f32.vlgmr.msra.gmra.mxu0 %vm216_vm11, %v819_v32 }
0x14ff   :  { %v874_v2 = vpop.permute.xlu1 %873 }
0x1575   :  { %v839_v34 = vpop.f32.mrf.mxu0 }
0x1576   :  { %v1888_v35 = vadd.f32 %v1735_v48, %v839_v34 }
0x1578   :  { %v843_v36 = vmul.f32 0.5, %v1888_v35 }
0x157a   :  { %v844_v37 = vmul.f32 1.442695, %v843_v36 }
0x157c   :  { %1288 = vpow2.f32 %v844_v37 }
0x1582   :  { %v1289_v38 = vpop.eup %1288 }
0x1583   :  { %847 = vrot.lane.b32.xlu2 %v1289_v38, %s1527_s24 }
0x158b   :  { %876 = vrot.lane.b32.xlu2 %v816_v30, %s1521_s12 }
0x15dd   :  { %v848_v42 = vpop.permute.xlu2 %847 }
0x15de   :  { %v850_v47 = vmul.f32 %v848_v42, %v842_v40 }
0x15e0   :  { %852 = vrot.lane.b32.xlu0 %v850_v47, %s1528_s25 }
0x15e5   :  { %v877_v4 = vpop.permute.xlu2 %876 }
0x1652   :  { %v853_v49 = vpop.permute.xlu0 %852 }
0x1653   :  { %v1894_v3 = vadd.f32 %v853_v49, %v1888_v35 }
0x1655   :  { %v879_v51 = vsel %vm133_vm1, %v1894_v3, %v874_v2 }
0x1656   :  { %v880_v6 = vsel %vm135_vm2, %v879_v51, %v877_v4 }
0x1657   :  { %1196 = vmatmul.msk.f32.vlgmr.msrb.gmra.mxu1 %vm140_vm3, %v880_v6 }
0x16d4   :  { %v901_v52 = vpop.f32.mrf.mxu1 }
0x16d5   :  { %v902_v53 = vadd.f32 %v1663_v12, %v901_v52 }
0x16d7   :  { %v1197_v54 = vmul.f32 -1.442695, %v902_v53 }
0x16d9   :  { %1290 = vpow2.f32 %v1197_v54 }
0x16df   :  { %v1291_v55 = vpop.eup %1290 }
0x16e0   :  { %v908_v56 = vadd.f32 1.0, %v1291_v55 }
0x16e2   :  { %1292 = vrcp.f32 %v908_v56  ;;  %v920_v61 = vand.u32 2147483648, %v908_v56  ;;  %v918_v63 = vand.u32 2147483647, %v908_v56  ;;  %vm914_vm14 = vweird.f32 %v908_v56 }
0x16e3   :  { %1294 = vtanh.f32 %v902_v53 }
0x16e4   :  { %v921_v1 = vor.u32 1.1754944e-38, %v920_v61  ;;  %vm919_vm4 = vcmp.eq.f32.partialorder %v918_v63, 8.507059e+37 }
0x16e8   :  { %v1293_v57 = vpop.eup %1292 }
0x16e9   :  { %v910_v58 = vmul.f32 %v1293_v57, %v908_v56  ;;  %vm915_vm13 = vweird.f32 %v1293_v57  ;;  %v1295_v9 = vpop.eup %1294 }
0x16ea   :  { %vm916_vm15 = vmor %vm914_vm14, %vm915_vm13 }
0x16eb   :  { %v911_v59 = vsub.f32 1.0, %v910_v58 }
0x16ed   :  { %v912_v62 = vmul.f32 %v1293_v57, %v911_v59 }
0x16ef   :  { %v913_v0 = vadd.f32 %v1293_v57, %v912_v62 }
0x16f1   :  { %v917_v8 = vsel %vm916_vm15, %v1293_v57, %v913_v0 }
0x16f2   :  { %v922_v10 = vsel %vm919_vm4, %v921_v1, %v917_v8 }
0x16f3   :  { %v924_v43 = vsel %vm1666_vm7, %v1295_v9, %v922_v10 }
0x16f4   :  { %927 = vrot.lane.b32.xlu0 %v924_v43, %s1519_s0  ;;  %v925_v46 = vmul.f32 %v924_v43, %v810_v27  ;;  %v967_v27 = vld [vmem:[#allocation5] sm:$0x3] }
0x1766   :  { %v928_v44 = vpop.permute.xlu0 %927 }
0x1767   :  { %v930_v45 = vmul.f32 %v928_v44, %v924_v43 }
0x1769   :  { %932 = vrot.lane.b32.xlu1 %v930_v45, %s1520_s30 }
0x17db   :  { %v933_v11 = vpop.permute.xlu1 %932 }
0x17dc   :  { %v935_v14 = vadd.f32 %v933_v11, %v925_v46 }
0x17de   :  { %1296 = vtanh.f32 %v935_v14 }
0x17e4   :  { %v1297_v15 = vpop.eup %1296 }
0x17e5   :  { %938 = vrot.lane.b32.xlu2 %v1297_v15, %s1519_s0 }
0x183f   :  { %v939_v16 = vpop.permute.xlu2 %938 }
0x1840   :  { %v941_v17 = vmul.f32 %v939_v16, %v924_v43 }
0x1842   :  { %943 = vrot.lane.b32.xlu0 %v941_v17, %s1520_s30 }
0x184a   :  { %998 = vrot.lane.b32.xlu0 %v996_v19, %s1529_s26 }
0x18b4   :  { %v944_v18 = vpop.permute.xlu0 %943 }
0x18b5   :  { %1198 = vmatmul.msk.f32.vlgmr.msrb.gmra.mxu3 %vm216_vm11, %v944_v18 }
0x18bc   :  { %v999_v32 = vpop.permute.xlu0 %998 }
0x1938   :  { %v964_v21 = vpop.f32.mrf.mxu3 }
0x1939   :  { %v1909_v22 = vadd.f32 %v1735_v48, %v964_v21 }
0x193b   :  { %v968_v23 = vmul.f32 0.5, %v1909_v22 }
0x193d   :  { %v969_v24 = vmul.f32 1.442695, %v968_v23 }
0x193f   :  { %1298 = vpow2.f32 %v969_v24 }
0x1945   :  { %v1299_v25 = vpop.eup %1298 }
0x1946   :  { %972 = vrot.lane.b32.xlu1 %v1299_v25, %s1530_s27 }
0x194e   :  { %1001 = vrot.lane.b32.xlu1 %v941_v17, %s1521_s12 }
0x19b8   :  { %v973_v28 = vpop.permute.xlu1 %972 }
0x19b9   :  { %v975_v29 = vmul.f32 %v973_v28, %v967_v27 }
0x19bb   :  { %977 = vrot.lane.b32.xlu2 %v975_v29, %s1529_s26 }
0x19c0   :  { %v1002_v36 = vpop.permute.xlu1 %1001 }
0x1a15   :  { %v978_v30 = vpop.permute.xlu2 %977 }
0x1a16   :  { %v1915_v34 = vadd.f32 %v978_v30, %v1909_v22 }
0x1a18   :  { %v1004_v37 = vsel %vm133_vm1, %v1915_v34, %v999_v32 }
0x1a19   :  { %v1005_v38 = vsel %vm135_vm2, %v1004_v37, %v1002_v36 }
0x1a1a   :  { %1200 = vmatmul.msk.f32.vlgmr.msrb.gmra.mxu0 %vm140_vm3, %v1005_v38 }
0x1a97   :  { %v1026_v39 = vpop.f32.mrf.mxu0 }
0x1a98   :  { %v1027_v40 = vadd.f32 %v1663_v12, %v1026_v39 }
0x1a9a   :  { %v1201_v42 = vmul.f32 -1.442695, %v1027_v40 }
0x1a9c   :  { %1300 = vpow2.f32 %v1201_v42 }
0x1aa2   :  { %v1301_v47 = vpop.eup %1300 }
0x1aa3   :  { %v1033_v49 = vadd.f32 1.0, %v1301_v47 }
0x1aa5   :  { %1302 = vrcp.f32 %v1033_v49  ;;  %v1045_v6 = vand.u32 2147483648, %v1033_v49  ;;  %v1043_v53 = vand.u32 2147483647, %v1033_v49  ;;  %vm1039_vm1 = vweird.f32 %v1033_v49 }
0x1aa6   :  { %1304 = vtanh.f32 %v1027_v40 }
0x1aa7   :  { %v1046_v55 = vor.u32 1.1754944e-38, %v1045_v6  ;;  %vm1044_vm3 = vcmp.eq.f32.partialorder %v1043_v53, 8.507059e+37 }
0x1aab   :  { %v1303_v2 = vpop.eup %1302 }
0x1aac   :  { %v1035_v4 = vmul.f32 %v1303_v2, %v1033_v49  ;;  %vm1040_vm5 = vweird.f32 %v1303_v2  ;;  %v1305_v12 = vpop.eup %1304 }
0x1aad   :  { %vm1041_vm2 = vmor %vm1039_vm1, %vm1040_vm5 }
0x1aae   :  { %v1036_v51 = vsub.f32 1.0, %v1035_v4 }
0x1ab0   :  { %v1037_v52 = vmul.f32 %v1303_v2, %v1036_v51 }
0x1ab2   :  { %v1038_v54 = vadd.f32 %v1303_v2, %v1037_v52 }
0x1ab4   :  { %v1042_v56 = vsel %vm1041_vm2, %v1303_v2, %v1038_v54 }
0x1ab5   :  { %v1047_v57 = vsel %vm1044_vm3, %v1046_v55, %v1042_v56 }
0x1ab6   :  { %v1049_v58 = vsel %vm1666_vm7, %v1305_v12, %v1047_v57  ;;  %vm363_vm7 = vcmask 9224  }
0x1ab7   :  { %1052 = vrot.lane.b32.xlu2 %v1049_v58, %s1519_s0  ;;  %v1050_v62 = vmul.f32 %v1049_v58, %v935_v14 }
0x1b11   :  { %v1053_v59 = vpop.permute.xlu2 %1052 }
0x1b12   :  { %v1055_v61 = vmul.f32 %v1053_v59, %v1049_v58 }
0x1b14   :  { %1057 = vrot.lane.b32.xlu0 %v1055_v61, %s1520_s30 }
0x1b86   :  { %v1058_v63 = vpop.permute.xlu0 %1057 }
0x1b87   :  { %v1060_v0 = vadd.f32 %v1058_v63, %v1050_v62 }
0x1b89   :  { %1306 = vtanh.f32 %v1060_v0 }
0x1b8f   :  { %v1307_v1 = vpop.eup %1306 }
0x1b90   :  { %1063 = vrot.lane.b32.xlu1 %v1307_v1, %s1519_s0 }
0x1b98   :  { %367 = vrot.lane.b32.xlu1 %v1781_v41, %s1517_s3 }
0x1c02   :  { %v1064_v8 = vpop.permute.xlu1 %1063 }
0x1c03   :  { %v1066_v9 = vmul.f32 %v1064_v8, %v1049_v58 }
0x1c05   :  { %1068 = vrot.lane.b32.xlu2 %v1066_v9, %s1520_s30  ;;  %s1139_s30 = sshll.u32 %s2018_s10, 4  ;;  %s1148_s10 = sshll.u32 %s1536_s9, 4  ;;  %s1140_s30 = int_to_ptr.hbm [resolvable:$true] %s1139_s30  ;;  %s1149_s10 = int_to_ptr.vmem [resolvable:$true] %s1148_s10 }
0x1c0a   :  { %v368_v26 = vpop.permute.xlu1 %367 }
0x1c0b   :  { %370 = vst.msk [vmem:[#allocation14] sm:$0x3] %vm363_vm7, %v368_v26 }
0x1c0d   :  { %252 = vrot.lane.b32.xlu2 %v1738_v50, %s1522_s6 }
0x1c15   :  { %482 = vrot.lane.b32.xlu2 %v1810_v20, %s1518_s20 }
0x1c1d   :  { %612 = vrot.lane.b32.xlu2 %v1845_v7, %s1518_s20 }
0x1c25   :  { %737 = vrot.lane.b32.xlu2 %v1867_v5, %s1525_s22 }
0x1c2d   :  { %862 = vrot.lane.b32.xlu2 %v1888_v35, %s1527_s24 }
0x1c35   :  { %987 = vrot.lane.b32.xlu2 %v1909_v22, %s1530_s27 }
0x1c5f   :  { %v1069_v41 = vpop.permute.xlu2 %1068 }
0x1c60   :  { %1202 = vmatmul.msk.f32.vlgmr.msrb.gmra.mxu2 %vm216_vm11, %v1069_v41  ;;  %vm485_vm11 = vcmask 17424  }
0x1c67   :  { %v253_v10 = vpop.permute.xlu2 %252 }
0x1c68   :  { %255 = vst.msk [vmem:[#allocation12] sm:$0x3] %vm249_vm12, %v253_v10  ;;  %vm610_vm12 = vcmask 25624  }
0x1c69   :  { %365 = vst.msk [vmem:[#allocation12] sm:$0x3] %vm363_vm7, %v1776_v33 }
0x1ce3   :  { %v1089_v50 = vpop.f32.mrf.mxu2 }
0x1ce4   :  { %v1948_v43 = vadd.f32 %v1735_v48, %v1089_v50  ;;  %v483_v48 = vpop.permute.xlu2 %482 }
0x1ce6   :  { %v1093_v44 = vmul.f32 0.5, %v1948_v43  ;;  %1112 = vrot.lane.b32.xlu2 %v1948_v43, %s1531_s28 }
0x1ce8   :  { %v1094_v45 = vmul.f32 1.442695, %v1093_v44 }
0x1cea   :  { %1308 = vpow2.f32 %v1094_v45 }
0x1cf0   :  { %v1309_v46 = vpop.eup %1308 }
0x1cf1   :  { %1097 = vrot.lane.b32.xlu0 %v1309_v46, %s1531_s28 }
0x1cf9   :  { %360 = vrot.lane.b32.xlu0 %v1776_v33, %s1517_s3  ;;  %v613_v33 = vpop.permute.xlu2 %612 }
0x1d01   :  { %487 = vrot.lane.b32.xlu0 %v1810_v20, %s1517_s3  ;;  %v738_v11 = vpop.permute.xlu2 %737  ;;  %v1092_v20 = vld [vmem:[#allocation5] sm:$0x3]  ;;  %s1533_s3 = smov 121  }
0x1d09   :  { %607 = vrot.lane.b32.xlu0 %v1845_v7, %s1525_s22  ;;  %v863_v7 = vpop.permute.xlu2 %862 }
0x1d11   :  { %732 = vrot.lane.b32.xlu0 %v1867_v5, %s1527_s24 }
0x1d19   :  { %857 = vrot.lane.b32.xlu0 %v1888_v35, %s1530_s27  ;;  %v988_v35 = vpop.permute.xlu2 %987 }
0x1d21   :  { %982 = vrot.lane.b32.xlu0 %v1909_v22, %s1531_s28 }
0x1d29   :  { %1107 = vrot.lane.b32.xlu0 %v1948_v43, %s1532_s29 }
0x1d40   :  { %v1113_v17 = vpop.permute.xlu2 %1112 }
0x1d63   :  { %v1098_v14 = vpop.permute.xlu0 %1097 }
0x1d64   :  { %v1100_v15 = vmul.f32 %v1098_v14, %v1092_v20 }
0x1d66   :  { %1102 = vrot.lane.b32.xlu1 %v1100_v15, %s1533_s3 }
0x1d6b   :  { %v361_v5 = vpop.permute.xlu0 %360 }
0x1d6c   :  { %364 = vst.msk [vmem:[#allocation11] sm:$0x3] %vm363_vm7, %v361_v5 }
0x1d6d   :  { %486 = vst.msk [vmem:[#allocation11] sm:$0x3] %vm485_vm11, %v483_v48 }
0x1d6e   :  { %492 = vrot.lane.b32.xlu1 %v1816_v31, %s1518_s20  ;;  %s1534_s20 = smov [#allocation12]  }
0x1d6f   :  { %s1137_s2 = sshll.u32 %s1534_s20, 4  ;;  %s1138_s2 = int_to_ptr.vmem [resolvable:$true] %s1137_s2 }
0x1d73   :  { %v488_v16 = vpop.permute.xlu0 %487 }
0x1d74   :  { %490 = vst.msk [vmem:[#allocation12] sm:$0x3] %vm485_vm11, %v488_v16 }
0x1d75   :  { %615 = vst.msk [vmem:[#allocation12] sm:$0x3] %vm610_vm12, %v613_v33 }
0x1d76   :  { %617 = vrot.lane.b32.xlu1 %v1851_v13, %s1525_s22  ;;  %740 = vst.msk [vmem:[#allocation12] sm:$0x3] %vm735_vm6, %v738_v11 }
0x1d77   :  { %865 = vst.msk [vmem:[#allocation12] sm:$0x3] %vm860_vm8, %v863_v7 }
0x1d78   :  { %990 = vst.msk [vmem:[#allocation12] sm:$0x3] %vm985_vm9, %v988_v35 }
0x1d79   :  { %1115 = vst.msk [vmem:[#allocation12] sm:$0x3] %vm1110_vm0, %v1113_v17 }
0x1d7a   :  { %1142 = dma.vmem_to_hbm [thread:$0]  %s1138_s2, 32, %s1140_s30, [#allocation13]  }
0x1d7b   :  { %v608_v31 = vpop.permute.xlu0 %607 }
0x1d7c   :  { %611 = vst.msk [vmem:[#allocation11] sm:$0x3] %vm610_vm12, %v608_v31 }
0x1d7e   :  { %742 = vrot.lane.b32.xlu1 %v1873_v60, %s1527_s24 }
0x1d83   :  { %v733_v18 = vpop.permute.xlu0 %732 }
0x1d84   :  { %736 = vst.msk [vmem:[#allocation11] sm:$0x3] %vm735_vm6, %v733_v18 }
0x1d86   :  { %867 = vrot.lane.b32.xlu1 %v1894_v3, %s1530_s27 }
0x1d8b   :  { %v858_v13 = vpop.permute.xlu0 %857 }
0x1d8c   :  { %861 = vst.msk [vmem:[#allocation11] sm:$0x3] %vm860_vm8, %v858_v13 }
0x1d8e   :  { %992 = vrot.lane.b32.xlu1 %v1915_v34, %s1531_s28 }
0x1d93   :  { %v983_v19 = vpop.permute.xlu0 %982 }
0x1d94   :  { %986 = vst.msk [vmem:[#allocation11] sm:$0x3] %vm985_vm9, %v983_v19 }
0x1d9b   :  { %v1108_v21 = vpop.permute.xlu0 %1107 }
0x1d9c   :  { %1111 = vst.msk [vmem:[#allocation11] sm:$0x3] %vm1110_vm0, %v1108_v21 }
0x1d9d   :  { %1131 = dma.vmem_to_hbm [thread:$0]  %s1127_s15, 32, %s1129_s14, [#allocation4]  }
0x1dd8   :  { %v1103_v60 = vpop.permute.xlu1 %1102 }
0x1dd9   :  { %v1105_v3 = vadd.f32 %v1103_v60, %v1948_v43 }
0x1ddb   :  { %1117 = vrot.lane.b32.xlu1 %v1105_v3, %s1532_s29 }
0x1de0   :  { %v493_v22 = vpop.permute.xlu1 %492 }
0x1de1   :  { %495 = vst.msk [vmem:[#allocation14] sm:$0x3] %vm485_vm11, %v493_v22 }
0x1de8   :  { %v618_v23 = vpop.permute.xlu1 %617 }
0x1de9   :  { %620 = vst.msk [vmem:[#allocation14] sm:$0x3] %vm610_vm12, %v618_v23 }
0x1df0   :  { %v743_v24 = vpop.permute.xlu1 %742 }
0x1df1   :  { %745 = vst.msk [vmem:[#allocation14] sm:$0x3] %vm735_vm6, %v743_v24 }
0x1df8   :  { %v868_v25 = vpop.permute.xlu1 %867 }
0x1df9   :  { %870 = vst.msk [vmem:[#allocation14] sm:$0x3] %vm860_vm8, %v868_v25 }
0x1e00   :  { %v993_v27 = vpop.permute.xlu1 %992 }
0x1e01   :  { %995 = vst.msk [vmem:[#allocation14] sm:$0x3] %vm985_vm9, %v993_v27 }
0x1e4d   :  { %v1118_v28 = vpop.permute.xlu1 %1117 }
0x1e4e   :  { %1120 = vst.msk [vmem:[#allocation14] sm:$0x3] %vm1110_vm0, %v1118_v28 }
0x1e4f   :  { %1153 = dma.vmem_to_hbm [thread:$0]  %s1149_s10, 32, %s1151_s18, [#allocation13]  }
0x1e50   :  { %1508 = dma.done.wait [#allocation4], 32  }
0x1e51   :  { %1509 = vsyncadd [#allocation4], 4294967264 }
0x1e52   :  { %1510 = dma.done.wait [#allocation13], 64  }
0x1e53   :  { %1511 = vsyncadd [#allocation13], 4294967232 }
0x1e54   :  { %1166 = vsyncpa [#allocation3], 1 }
0x1e55   :  { %1167 = vsyncpa [#allocation6], 1 }
0x1e56   :  { %1168 = vsyncpa [#allocation9], 1 }
0x1e57   :  { %1169 = vsyncpa [#allocation4], 1 }
0x1e58   :  { %1170 = vsyncpa [#allocation13], 1 }

</bundles_post_ra>
